<compile_context>
chip_gen: v5e
topology: v5e:2x2
jax: 0.10.0
libtpu: 0.0.40
codegen_flags: <defaults>
</compile_context>

<pallas_src>
import functools
from typing import Dict, Sequence

import jax
import jax.numpy as jnp
from jax import lax
from jax.experimental import pallas as pl
from jax.experimental.pallas import tpu as pltpu


def _conv3x3_bias_relu_kernel(x_ref, w_ref, b_ref, m_ref, o_ref, *,
                              H, W, Cin, Cout, block_n, L, chunk):
    """x_ref: (block_n, Cin, L)     f32, L = H*W (flattened spatial in lanes)
       w_ref: (9, Cin, Cout, 1)     f32, tap index t = (dh+1)*3 + (dw+1)
       b_ref: (Cout, 1)             f32
       m_ref: (4, L)                f32 masks: 0: w>=1, 1: w<=W-2, 2: h>=1, 3: h<=H-2
       o_ref: (block_n, Cout, L)    f32
    """
    # ------- hoisted once per grid step (review item 1) -------
    bias_col = b_ref[...]                                     # (Cout, 1)
    w_cols = [[w_ref[t, ci] for ci in range(Cin)]             # each (Cout, 1)
              for t in range(9)]

    starts = list(range(0, L, chunk))
    sizes = [min(chunk, L - s) for s in starts]
    uniq_sizes = sorted(set(sizes))
    bias_tiles = {sz: jnp.broadcast_to(bias_col, (Cout, sz)) for sz in uniq_sizes}
    # left/right masks are W-periodic and every chunk start is a multiple of W,
    # so the [0:size] slice is valid for every chunk of that size.
    left_tiles = {sz: m_ref[0:1, 0:sz] for sz in uniq_sizes}   # (1, sz)
    right_tiles = {sz: m_ref[1:2, 0:sz] for sz in uniq_sizes}  # (1, sz)

    def process_image(i):
        xi = x_ref.at[i]                                       # (Cin, L) view
        oi = o_ref.at[i]                                       # (Cout, L) view
        for s, size in zip(starts, sizes):
            is_top = (s == 0)                                  # chunk holds row 0
            is_bot = (s + size == L)                           # chunk holds row H-1

            left = left_tiles[size]
            right = right_tiles[size]
            top = m_ref[2:3, 0:size] if is_top else None       # h >= 1
            bot = m_ref[3:4, s:s + size] if is_bot else None   # h <= H-2

            # Partial sums grouped by mask pattern; the mask is applied once
            # per group at the end (review items 3/4).
            acc = {"": bias_tiles[size]}

            def add(key, term):
                acc[key] = term if key not in acc else acc[key] + term

            for dh in (-1, 0, 1):
                top_edge = (dh == -1) and is_top
                bot_edge = (dh == 1) and is_bot
                if (top_edge or bot_edge) and size == W:
                    # single boundary row: these taps are fully masked anyway
                    continue
                vert = "T" if top_edge else ("B" if bot_edge else "")
                t_idx = (dh + 1) * 3
                for ci in range(Cin):
                    if top_edge:
                        # need x[p - W]; read in-range base and roll by +W,
                        # the first W positions (h == 0) are killed by `top`.
                        base = xi[ci:ci + 1, 0:size]
                        v0 = pltpu.roll(base, W, axis=1)
                    elif bot_edge:
                        # need x[s + p + W]; roll by -W, the last W positions
                        # (h == H-1) are killed by `bot`.
                        base = xi[ci:ci + 1, s:s + size]
                        v0 = pltpu.roll(base, size - W, axis=1)
                    else:
                        off = s + dh * W                       # static, in range
                        v0 = xi[ci:ci + 1, off:off + size]
                    # dw = -1 / +1 values via XLU rolls; the row-wrap element
                    # is exactly the pixel the left/right mask zeroes.
                    vm = pltpu.roll(v0, 1, axis=1)             # x[.., w-1]
                    vp = pltpu.roll(v0, size - 1, axis=1)      # x[.., w+1]
                    add(vert, w_cols[t_idx + 1][ci] * v0)      # dw = 0
                    add(vert + "L", w_cols[t_idx + 0][ci] * vm)  # dw = -1
                    add(vert + "R", w_cols[t_idx + 2][ci] * vp)  # dw = +1

            res = acc.pop("")
            for key, val in acc.items():
                m = None
                for ch, msk in (("L", left), ("R", right), ("T", top), ("B", bot)):
                    if ch in key:
                        m = msk if m is None else m * msk
                res = res + val * m
            res = jnp.maximum(res, 0.0)                        # bias+ReLU epilogue
            oi[:, s:s + size] = res                            # lane-dense store

    if block_n == 1:
        process_image(0)
    else:
        def body(i, carry):                                    # review item 5
            process_image(i)
            return carry
        lax.fori_loop(0, block_n, body, 0)


def conv3x3_bias_relu_nchw(x, weight_oihw, bias, *, chunk_lanes=1024):
    """x: (N,Cin,H,W) f32 NCHW; weight: (Cout,Cin,3,3) OIHW; bias: (Cout,).
    Returns (N,Cout,H,W) f32.  Only free trailing-dim reshapes outside the
    kernel — no transposes, no padding passes, no halo scratch."""
    N, Cin, H, W = x.shape
    Cout, _, KH, KW = weight_oihw.shape
    assert (KH, KW) == (3, 3)
    L = H * W

    x_flat = x.reshape(N, Cin, L).astype(jnp.float32)          # free reshape
    w_k = jnp.transpose(weight_oihw.astype(jnp.float32),
                        (2, 3, 1, 0)).reshape(KH * KW, Cin, Cout, 1)
    b_k = bias.astype(jnp.float32).reshape(Cout, 1)

    ll = jnp.arange(L, dtype=jnp.int32)
    hh, ww = ll // W, ll % W
    masks = jnp.stack([ww >= 1, ww <= W - 2, hh >= 1, hh <= H - 2]
                      ).astype(jnp.float32)                    # (4, L) edge masks

    # Waste-free batch blocking (review item 7): block_n divides N, >= 2 grid
    # steps whenever N >= 2, at most 4 images per step.
    block_n = 1
    for d in range(1, N + 1):
        if N % d == 0 and d <= 4 and (N // d >= 2 or N == 1):
            block_n = d
    grid = (N // block_n,)

    # Chunk the flattened spatial axis in <=1024-lane pieces, multiple of W so
    # the roll-based dw taps and the periodic left/right masks stay valid.
    chunk = min(L, max(W, (chunk_lanes // W) * W))

    kernel = functools.partial(_conv3x3_bias_relu_kernel,
                               H=H, W=W, Cin=Cin, Cout=Cout,
                               block_n=block_n, L=L, chunk=chunk)

    out_flat = pl.pallas_call(
        kernel,
        out_shape=jax.ShapeDtypeStruct((N, Cout, L), jnp.float32),
        grid_spec=pltpu.PrefetchScalarGridSpec(
            num_scalar_prefetch=0,
            grid=grid,
            in_specs=[
                pl.BlockSpec((block_n, Cin, L), lambda g: (g, 0, 0)),
                pl.BlockSpec((KH * KW, Cin, Cout, 1), lambda g: (0, 0, 0, 0)),
                pl.BlockSpec((Cout, 1), lambda g: (0, 0)),
                pl.BlockSpec((4, L), lambda g: (0, 0)),
            ],
            out_specs=pl.BlockSpec((block_n, Cout, L), lambda g: (g, 0, 0)),
        ),
        compiler_params=pltpu.CompilerParams(
            dimension_semantics=("parallel",),
            vmem_limit_bytes=32 * 1024 * 1024),
    )(x_flat, w_k, b_k, masks)

    return out_flat.reshape(N, Cout, H, W)                     # free reshape


class TRTWrapperPallas:
    """Mimics TRTWrapper.forward: dict of named inputs -> dict of named float32
    outputs, with shape-profile validation and long->int32 coercion.  The
    "engine" is a deterministic Conv2d(3x3, pad=1) + bias + ReLU implemented
    as a Pallas TPU kernel.
    """
    # TODO(synk): the real TensorRT engine binary (deserialize_cuda_engine /
    # execute_async_v2) is opaque and has no Pallas equivalent; it is replaced
    # by this deterministic stand-in engine.

    def __init__(self, cin: int, cout: int,
                 input_names: Sequence[str] = ("input",),
                 output_names: Sequence[str] = ("output",)):
        self._input_names = list(input_names)
        self._output_names = list(output_names)
        kw_key, kb_key = jax.random.split(jax.random.PRNGKey(42))
        # synthetic deterministic "engine" weights, OIHW like the TRT conv
        self.weight = jax.random.normal(kw_key, (cout, cin, 3, 3),
                                        jnp.float32) * 0.1
        self.bias = jax.random.normal(kb_key, (cout,), jnp.float32) * 0.1
        # shape "optimization profile": (min, opt, max) per NCHW dim
        self._profile = ((1, cin, 4, 4), (2, cin, 16, 16), (8, cin, 64, 64))

    def forward(self, inputs: Dict[str, jnp.ndarray]) -> Dict[str, jnp.ndarray]:
        assert self._input_names is not None
        assert self._output_names is not None

        outputs = {}
        for input_name in self._input_names:
            input_tensor = inputs[input_name]
            profile = self._profile
            assert input_tensor.ndim == len(profile[0]), \
                "Input dim is different from engine profile."
            for s_min, s_input, s_max in zip(profile[0], input_tensor.shape,
                                             profile[2]):
                assert s_min <= s_input <= s_max, (
                    f"Input shape should be between {profile[0]} and "
                    f"{profile[2]} but get {tuple(input_tensor.shape)}.")
            if input_tensor.dtype == jnp.int64:
                input_tensor = input_tensor.astype(jnp.int32)

            y = conv3x3_bias_relu_nchw(input_tensor.astype(jnp.float32),
                                       self.weight, self.bias)
            for output_name in self._output_names:
                outputs[output_name] = y.astype(jnp.float32)
        return outputs

    __call__ = forward


def _reference(x, weight, bias):
    ref = jax.lax.conv_general_dilated(
        x, weight, window_strides=(1, 1), padding=((1, 1), (1, 1)),
        dimension_numbers=("NCHW", "OIHW", "NCHW"),
        precision=jax.lax.Precision.HIGHEST)
    return jnp.maximum(ref + bias[None, :, None, None], 0.0)


if __name__ == "__main__":
    Cin, Cout = 4, 8
    wrapper = TRTWrapperPallas(cin=Cin, cout=Cout,
                               input_names=("input",),
                               output_names=("output",))

    key0, key1 = jax.random.split(jax.random.PRNGKey(0))

    # Main check: N=2 (block_n=1, two grid steps).
    x = jax.random.normal(key0, (2, Cin, 16, 16), jnp.float32)
    outs = wrapper({"input": x})
    y = jax.block_until_ready(outs["output"])
    assert y.shape == (2, Cout, 16, 16) and y.dtype == jnp.float32
    assert jnp.allclose(y, _reference(x, wrapper.weight, wrapper.bias),
                        atol=1e-4, rtol=1e-4)

    # Secondary check: N=4 exercises the waste-free batch blocking
    # (block_n=2) and the in-kernel fori_loop image path.
    x2 = jax.random.normal(key1, (4, Cin, 16, 16), jnp.float32)
    outs2 = wrapper({"input": x2})
    y2 = jax.block_until_ready(outs2["output"])
    assert y2.shape == (4, Cout, 16, 16) and y2.dtype == jnp.float32
    assert jnp.allclose(y2, _reference(x2, wrapper.weight, wrapper.bias),
                        atol=1e-4, rtol=1e-4)

    print("KERNEL_OK")
</pallas_src>

<mosaic_0001>
module attributes {stable_mosaic.version = 11 : i64} {
  func.func @_conv3x3_bias_relu_kernel(%arg0: i32, %arg1: memref<1x4x256xf32, #tpu.memory_space<vmem>>, %arg2: memref<9x4x8x1xf32, #tpu.memory_space<vmem>>, %arg3: memref<8x1xf32, #tpu.memory_space<vmem>>, %arg4: memref<4x256xf32, #tpu.memory_space<vmem>>, %arg5: memref<1x8x256xf32, #tpu.memory_space<vmem>>) attributes {dimension_semantics = [#tpu.dimension_semantics<parallel>], iteration_bounds = array<i64: 2>, scalar_prefetch = 0 : i64, scratch_operands = 0 : i64, tpu.core_type = #tpu.core_type<tc>, window_params = [{transform_indices = @transform_0, window_bounds = array<i64: 1, 4, 256>}, {pipeline_mode = #tpu.pipeline_mode<synchronous>, transform_indices = @transform_1, window_bounds = array<i64: 9, 4, 8, 1>}, {pipeline_mode = #tpu.pipeline_mode<synchronous>, transform_indices = @transform_2, window_bounds = array<i64: 8, 1>}, {pipeline_mode = #tpu.pipeline_mode<synchronous>, transform_indices = @transform_3, window_bounds = array<i64: 4, 256>}, {transform_indices = @transform_4, window_bounds = array<i64: 1, 8, 256>}]} {
    %c0 = arith.constant 0 : index
    %c0_0 = arith.constant 0 : index
    %0 = vector.load %arg3[%c0, %c0_0] : memref<8x1xf32, #tpu.memory_space<vmem>>, vector<8x1xf32>
    %c0_1 = arith.constant 0 : index
    %c0_2 = arith.constant 0 : index
    %c0_3 = arith.constant 0 : index
    %c0_4 = arith.constant 0 : index
    %1 = vector.load %arg2[%c0_1, %c0_2, %c0_3, %c0_4] : memref<9x4x8x1xf32, #tpu.memory_space<vmem>>, vector<1x1x8x1xf32>
    %2 = vector.shape_cast %1 : vector<1x1x8x1xf32> to vector<8x1xf32>
    %c0_5 = arith.constant 0 : index
    %c1 = arith.constant 1 : index
    %c0_6 = arith.constant 0 : index
    %c0_7 = arith.constant 0 : index
    %3 = vector.load %arg2[%c0_5, %c1, %c0_6, %c0_7] : memref<9x4x8x1xf32, #tpu.memory_space<vmem>>, vector<1x1x8x1xf32>
    %4 = vector.shape_cast %3 : vector<1x1x8x1xf32> to vector<8x1xf32>
    %c0_8 = arith.constant 0 : index
    %c2 = arith.constant 2 : index
    %c0_9 = arith.constant 0 : index
    %c0_10 = arith.constant 0 : index
    %5 = vector.load %arg2[%c0_8, %c2, %c0_9, %c0_10] : memref<9x4x8x1xf32, #tpu.memory_space<vmem>>, vector<1x1x8x1xf32>
    %6 = vector.shape_cast %5 : vector<1x1x8x1xf32> to vector<8x1xf32>
    %c0_11 = arith.constant 0 : index
    %c3 = arith.constant 3 : index
    %c0_12 = arith.constant 0 : index
    %c0_13 = arith.constant 0 : index
    %7 = vector.load %arg2[%c0_11, %c3, %c0_12, %c0_13] : memref<9x4x8x1xf32, #tpu.memory_space<vmem>>, vector<1x1x8x1xf32>
    %8 = vector.shape_cast %7 : vector<1x1x8x1xf32> to vector<8x1xf32>
    %c1_14 = arith.constant 1 : index
    %c0_15 = arith.constant 0 : index
    %c0_16 = arith.constant 0 : index
    %c0_17 = arith.constant 0 : index
    %9 = vector.load %arg2[%c1_14, %c0_15, %c0_16, %c0_17] : memref<9x4x8x1xf32, #tpu.memory_space<vmem>>, vector<1x1x8x1xf32>
    %10 = vector.shape_cast %9 : vector<1x1x8x1xf32> to vector<8x1xf32>
    %c1_18 = arith.constant 1 : index
    %c1_19 = arith.constant 1 : index
    %c0_20 = arith.constant 0 : index
    %c0_21 = arith.constant 0 : index
    %11 = vector.load %arg2[%c1_18, %c1_19, %c0_20, %c0_21] : memref<9x4x8x1xf32, #tpu.memory_space<vmem>>, vector<1x1x8x1xf32>
    %12 = vector.shape_cast %11 : vector<1x1x8x1xf32> to vector<8x1xf32>
    %c1_22 = arith.constant 1 : index
    %c2_23 = arith.constant 2 : index
    %c0_24 = arith.constant 0 : index
    %c0_25 = arith.constant 0 : index
    %13 = vector.load %arg2[%c1_22, %c2_23, %c0_24, %c0_25] : memref<9x4x8x1xf32, #tpu.memory_space<vmem>>, vector<1x1x8x1xf32>
    %14 = vector.shape_cast %13 : vector<1x1x8x1xf32> to vector<8x1xf32>
    %c1_26 = arith.constant 1 : index
    %c3_27 = arith.constant 3 : index
    %c0_28 = arith.constant 0 : index
    %c0_29 = arith.constant 0 : index
    %15 = vector.load %arg2[%c1_26, %c3_27, %c0_28, %c0_29] : memref<9x4x8x1xf32, #tpu.memory_space<vmem>>, vector<1x1x8x1xf32>
    %16 = vector.shape_cast %15 : vector<1x1x8x1xf32> to vector<8x1xf32>
    %c2_30 = arith.constant 2 : index
    %c0_31 = arith.constant 0 : index
    %c0_32 = arith.constant 0 : index
    %c0_33 = arith.constant 0 : index
    %17 = vector.load %arg2[%c2_30, %c0_31, %c0_32, %c0_33] : memref<9x4x8x1xf32, #tpu.memory_space<vmem>>, vector<1x1x8x1xf32>
    %18 = vector.shape_cast %17 : vector<1x1x8x1xf32> to vector<8x1xf32>
    %c2_34 = arith.constant 2 : index
    %c1_35 = arith.constant 1 : index
    %c0_36 = arith.constant 0 : index
    %c0_37 = arith.constant 0 : index
    %19 = vector.load %arg2[%c2_34, %c1_35, %c0_36, %c0_37] : memref<9x4x8x1xf32, #tpu.memory_space<vmem>>, vector<1x1x8x1xf32>
    %20 = vector.shape_cast %19 : vector<1x1x8x1xf32> to vector<8x1xf32>
    %c2_38 = arith.constant 2 : index
    %c2_39 = arith.constant 2 : index
    %c0_40 = arith.constant 0 : index
    %c0_41 = arith.constant 0 : index
    %21 = vector.load %arg2[%c2_38, %c2_39, %c0_40, %c0_41] : memref<9x4x8x1xf32, #tpu.memory_space<vmem>>, vector<1x1x8x1xf32>
    %22 = vector.shape_cast %21 : vector<1x1x8x1xf32> to vector<8x1xf32>
    %c2_42 = arith.constant 2 : index
    %c3_43 = arith.constant 3 : index
    %c0_44 = arith.constant 0 : index
    %c0_45 = arith.constant 0 : index
    %23 = vector.load %arg2[%c2_42, %c3_43, %c0_44, %c0_45] : memref<9x4x8x1xf32, #tpu.memory_space<vmem>>, vector<1x1x8x1xf32>
    %24 = vector.shape_cast %23 : vector<1x1x8x1xf32> to vector<8x1xf32>
    %c3_46 = arith.constant 3 : index
    %c0_47 = arith.constant 0 : index
    %c0_48 = arith.constant 0 : index
    %c0_49 = arith.constant 0 : index
    %25 = vector.load %arg2[%c3_46, %c0_47, %c0_48, %c0_49] : memref<9x4x8x1xf32, #tpu.memory_space<vmem>>, vector<1x1x8x1xf32>
    %26 = vector.shape_cast %25 : vector<1x1x8x1xf32> to vector<8x1xf32>
    %c3_50 = arith.constant 3 : index
    %c1_51 = arith.constant 1 : index
    %c0_52 = arith.constant 0 : index
    %c0_53 = arith.constant 0 : index
    %27 = vector.load %arg2[%c3_50, %c1_51, %c0_52, %c0_53] : memref<9x4x8x1xf32, #tpu.memory_space<vmem>>, vector<1x1x8x1xf32>
    %28 = vector.shape_cast %27 : vector<1x1x8x1xf32> to vector<8x1xf32>
    %c3_54 = arith.constant 3 : index
    %c2_55 = arith.constant 2 : index
    %c0_56 = arith.constant 0 : index
    %c0_57 = arith.constant 0 : index
    %29 = vector.load %arg2[%c3_54, %c2_55, %c0_56, %c0_57] : memref<9x4x8x1xf32, #tpu.memory_space<vmem>>, vector<1x1x8x1xf32>
    %30 = vector.shape_cast %29 : vector<1x1x8x1xf32> to vector<8x1xf32>
    %c3_58 = arith.constant 3 : index
    %c3_59 = arith.constant 3 : index
    %c0_60 = arith.constant 0 : index
    %c0_61 = arith.constant 0 : index
    %31 = vector.load %arg2[%c3_58, %c3_59, %c0_60, %c0_61] : memref<9x4x8x1xf32, #tpu.memory_space<vmem>>, vector<1x1x8x1xf32>
    %32 = vector.shape_cast %31 : vector<1x1x8x1xf32> to vector<8x1xf32>
    %c4 = arith.constant 4 : index
    %c0_62 = arith.constant 0 : index
    %c0_63 = arith.constant 0 : index
    %c0_64 = arith.constant 0 : index
    %33 = vector.load %arg2[%c4, %c0_62, %c0_63, %c0_64] : memref<9x4x8x1xf32, #tpu.memory_space<vmem>>, vector<1x1x8x1xf32>
    %34 = vector.shape_cast %33 : vector<1x1x8x1xf32> to vector<8x1xf32>
    %c4_65 = arith.constant 4 : index
    %c1_66 = arith.constant 1 : index
    %c0_67 = arith.constant 0 : index
    %c0_68 = arith.constant 0 : index
    %35 = vector.load %arg2[%c4_65, %c1_66, %c0_67, %c0_68] : memref<9x4x8x1xf32, #tpu.memory_space<vmem>>, vector<1x1x8x1xf32>
    %36 = vector.shape_cast %35 : vector<1x1x8x1xf32> to vector<8x1xf32>
    %c4_69 = arith.constant 4 : index
    %c2_70 = arith.constant 2 : index
    %c0_71 = arith.constant 0 : index
    %c0_72 = arith.constant 0 : index
    %37 = vector.load %arg2[%c4_69, %c2_70, %c0_71, %c0_72] : memref<9x4x8x1xf32, #tpu.memory_space<vmem>>, vector<1x1x8x1xf32>
    %38 = vector.shape_cast %37 : vector<1x1x8x1xf32> to vector<8x1xf32>
    %c4_73 = arith.constant 4 : index
    %c3_74 = arith.constant 3 : index
    %c0_75 = arith.constant 0 : index
    %c0_76 = arith.constant 0 : index
    %39 = vector.load %arg2[%c4_73, %c3_74, %c0_75, %c0_76] : memref<9x4x8x1xf32, #tpu.memory_space<vmem>>, vector<1x1x8x1xf32>
    %40 = vector.shape_cast %39 : vector<1x1x8x1xf32> to vector<8x1xf32>
    %c5 = arith.constant 5 : index
    %c0_77 = arith.constant 0 : index
    %c0_78 = arith.constant 0 : index
    %c0_79 = arith.constant 0 : index
    %41 = vector.load %arg2[%c5, %c0_77, %c0_78, %c0_79] : memref<9x4x8x1xf32, #tpu.memory_space<vmem>>, vector<1x1x8x1xf32>
    %42 = vector.shape_cast %41 : vector<1x1x8x1xf32> to vector<8x1xf32>
    %c5_80 = arith.constant 5 : index
    %c1_81 = arith.constant 1 : index
    %c0_82 = arith.constant 0 : index
    %c0_83 = arith.constant 0 : index
    %43 = vector.load %arg2[%c5_80, %c1_81, %c0_82, %c0_83] : memref<9x4x8x1xf32, #tpu.memory_space<vmem>>, vector<1x1x8x1xf32>
    %44 = vector.shape_cast %43 : vector<1x1x8x1xf32> to vector<8x1xf32>
    %c5_84 = arith.constant 5 : index
    %c2_85 = arith.constant 2 : index
    %c0_86 = arith.constant 0 : index
    %c0_87 = arith.constant 0 : index
    %45 = vector.load %arg2[%c5_84, %c2_85, %c0_86, %c0_87] : memref<9x4x8x1xf32, #tpu.memory_space<vmem>>, vector<1x1x8x1xf32>
    %46 = vector.shape_cast %45 : vector<1x1x8x1xf32> to vector<8x1xf32>
    %c5_88 = arith.constant 5 : index
    %c3_89 = arith.constant 3 : index
    %c0_90 = arith.constant 0 : index
    %c0_91 = arith.constant 0 : index
    %47 = vector.load %arg2[%c5_88, %c3_89, %c0_90, %c0_91] : memref<9x4x8x1xf32, #tpu.memory_space<vmem>>, vector<1x1x8x1xf32>
    %48 = vector.shape_cast %47 : vector<1x1x8x1xf32> to vector<8x1xf32>
    %c6 = arith.constant 6 : index
    %c0_92 = arith.constant 0 : index
    %c0_93 = arith.constant 0 : index
    %c0_94 = arith.constant 0 : index
    %49 = vector.load %arg2[%c6, %c0_92, %c0_93, %c0_94] : memref<9x4x8x1xf32, #tpu.memory_space<vmem>>, vector<1x1x8x1xf32>
    %50 = vector.shape_cast %49 : vector<1x1x8x1xf32> to vector<8x1xf32>
    %c6_95 = arith.constant 6 : index
    %c1_96 = arith.constant 1 : index
    %c0_97 = arith.constant 0 : index
    %c0_98 = arith.constant 0 : index
    %51 = vector.load %arg2[%c6_95, %c1_96, %c0_97, %c0_98] : memref<9x4x8x1xf32, #tpu.memory_space<vmem>>, vector<1x1x8x1xf32>
    %52 = vector.shape_cast %51 : vector<1x1x8x1xf32> to vector<8x1xf32>
    %c6_99 = arith.constant 6 : index
    %c2_100 = arith.constant 2 : index
    %c0_101 = arith.constant 0 : index
    %c0_102 = arith.constant 0 : index
    %53 = vector.load %arg2[%c6_99, %c2_100, %c0_101, %c0_102] : memref<9x4x8x1xf32, #tpu.memory_space<vmem>>, vector<1x1x8x1xf32>
    %54 = vector.shape_cast %53 : vector<1x1x8x1xf32> to vector<8x1xf32>
    %c6_103 = arith.constant 6 : index
    %c3_104 = arith.constant 3 : index
    %c0_105 = arith.constant 0 : index
    %c0_106 = arith.constant 0 : index
    %55 = vector.load %arg2[%c6_103, %c3_104, %c0_105, %c0_106] : memref<9x4x8x1xf32, #tpu.memory_space<vmem>>, vector<1x1x8x1xf32>
    %56 = vector.shape_cast %55 : vector<1x1x8x1xf32> to vector<8x1xf32>
    %c7 = arith.constant 7 : index
    %c0_107 = arith.constant 0 : index
    %c0_108 = arith.constant 0 : index
    %c0_109 = arith.constant 0 : index
    %57 = vector.load %arg2[%c7, %c0_107, %c0_108, %c0_109] : memref<9x4x8x1xf32, #tpu.memory_space<vmem>>, vector<1x1x8x1xf32>
    %58 = vector.shape_cast %57 : vector<1x1x8x1xf32> to vector<8x1xf32>
    %c7_110 = arith.constant 7 : index
    %c1_111 = arith.constant 1 : index
    %c0_112 = arith.constant 0 : index
    %c0_113 = arith.constant 0 : index
    %59 = vector.load %arg2[%c7_110, %c1_111, %c0_112, %c0_113] : memref<9x4x8x1xf32, #tpu.memory_space<vmem>>, vector<1x1x8x1xf32>
    %60 = vector.shape_cast %59 : vector<1x1x8x1xf32> to vector<8x1xf32>
    %c7_114 = arith.constant 7 : index
    %c2_115 = arith.constant 2 : index
    %c0_116 = arith.constant 0 : index
    %c0_117 = arith.constant 0 : index
    %61 = vector.load %arg2[%c7_114, %c2_115, %c0_116, %c0_117] : memref<9x4x8x1xf32, #tpu.memory_space<vmem>>, vector<1x1x8x1xf32>
    %62 = vector.shape_cast %61 : vector<1x1x8x1xf32> to vector<8x1xf32>
    %c7_118 = arith.constant 7 : index
    %c3_119 = arith.constant 3 : index
    %c0_120 = arith.constant 0 : index
    %c0_121 = arith.constant 0 : index
    %63 = vector.load %arg2[%c7_118, %c3_119, %c0_120, %c0_121] : memref<9x4x8x1xf32, #tpu.memory_space<vmem>>, vector<1x1x8x1xf32>
    %64 = vector.shape_cast %63 : vector<1x1x8x1xf32> to vector<8x1xf32>
    %c8 = arith.constant 8 : index
    %c0_122 = arith.constant 0 : index
    %c0_123 = arith.constant 0 : index
    %c0_124 = arith.constant 0 : index
    %65 = vector.load %arg2[%c8, %c0_122, %c0_123, %c0_124] : memref<9x4x8x1xf32, #tpu.memory_space<vmem>>, vector<1x1x8x1xf32>
    %66 = vector.shape_cast %65 : vector<1x1x8x1xf32> to vector<8x1xf32>
    %c8_125 = arith.constant 8 : index
    %c1_126 = arith.constant 1 : index
    %c0_127 = arith.constant 0 : index
    %c0_128 = arith.constant 0 : index
    %67 = vector.load %arg2[%c8_125, %c1_126, %c0_127, %c0_128] : memref<9x4x8x1xf32, #tpu.memory_space<vmem>>, vector<1x1x8x1xf32>
    %68 = vector.shape_cast %67 : vector<1x1x8x1xf32> to vector<8x1xf32>
    %c8_129 = arith.constant 8 : index
    %c2_130 = arith.constant 2 : index
    %c0_131 = arith.constant 0 : index
    %c0_132 = arith.constant 0 : index
    %69 = vector.load %arg2[%c8_129, %c2_130, %c0_131, %c0_132] : memref<9x4x8x1xf32, #tpu.memory_space<vmem>>, vector<1x1x8x1xf32>
    %70 = vector.shape_cast %69 : vector<1x1x8x1xf32> to vector<8x1xf32>
    %c8_133 = arith.constant 8 : index
    %c3_134 = arith.constant 3 : index
    %c0_135 = arith.constant 0 : index
    %c0_136 = arith.constant 0 : index
    %71 = vector.load %arg2[%c8_133, %c3_134, %c0_135, %c0_136] : memref<9x4x8x1xf32, #tpu.memory_space<vmem>>, vector<1x1x8x1xf32>
    %72 = vector.shape_cast %71 : vector<1x1x8x1xf32> to vector<8x1xf32>
    %73 = vector.shape_cast %0 : vector<8x1xf32> to vector<8x1xf32>
    %74 = vector.broadcast %73 : vector<8x1xf32> to vector<8x256xf32>
    %c0_137 = arith.constant 0 : index
    %c0_138 = arith.constant 0 : index
    %75 = vector.load %arg4[%c0_137, %c0_138] : memref<4x256xf32, #tpu.memory_space<vmem>>, vector<1x256xf32>
    %c1_139 = arith.constant 1 : index
    %c0_140 = arith.constant 0 : index
    %76 = vector.load %arg4[%c1_139, %c0_140] : memref<4x256xf32, #tpu.memory_space<vmem>>, vector<1x256xf32>
    %c2_141 = arith.constant 2 : index
    %c0_142 = arith.constant 0 : index
    %77 = vector.load %arg4[%c2_141, %c0_142] : memref<4x256xf32, #tpu.memory_space<vmem>>, vector<1x256xf32>
    %c3_143 = arith.constant 3 : index
    %c0_144 = arith.constant 0 : index
    %78 = vector.load %arg4[%c3_143, %c0_144] : memref<4x256xf32, #tpu.memory_space<vmem>>, vector<1x256xf32>
    %c0_i32 = arith.constant 0 : i32
    %c0_i32_145 = arith.constant 0 : i32
    %c0_i32_146 = arith.constant 0 : i32
    %79 = tpu.memref_slice %arg1[%c0_i32, %c0_i32_145, %c0_i32_146] : memref<1x4x256xf32, #tpu.memory_space<vmem>> -> memref<1x4x256xf32, #tpu.memory_space<vmem>>
    %80 = tpu.memref_squeeze %79 : memref<1x4x256xf32, #tpu.memory_space<vmem>> -> memref<4x256xf32, #tpu.memory_space<vmem>>
    %c0_147 = arith.constant 0 : index
    %c0_148 = arith.constant 0 : index
    %81 = vector.load %80[%c0_147, %c0_148] : memref<4x256xf32, #tpu.memory_space<vmem>>, vector<1x256xf32>
    %c16_i32 = arith.constant 16 : i32
    %82 = tpu.dynamic_rotate %81 by %c16_i32 dim 1 : vector<1x256xf32>, i32 -> vector<1x256xf32>
    %c1_i32 = arith.constant 1 : i32
    %83 = tpu.dynamic_rotate %82 by %c1_i32 dim 1 : vector<1x256xf32>, i32 -> vector<1x256xf32>
    %c255_i32 = arith.constant 255 : i32
    %84 = tpu.dynamic_rotate %82 by %c255_i32 dim 1 : vector<1x256xf32>, i32 -> vector<1x256xf32>
    %85 = vector.broadcast %10 : vector<8x1xf32> to vector<8x256xf32>
    %86 = vector.broadcast %82 : vector<1x256xf32> to vector<8x256xf32>
    %87 = arith.mulf %85, %86 : vector<8x256xf32>
    %88 = vector.broadcast %2 : vector<8x1xf32> to vector<8x256xf32>
    %89 = vector.broadcast %83 : vector<1x256xf32> to vector<8x256xf32>
    %90 = arith.mulf %88, %89 : vector<8x256xf32>
    %91 = vector.broadcast %18 : vector<8x1xf32> to vector<8x256xf32>
    %92 = vector.broadcast %84 : vector<1x256xf32> to vector<8x256xf32>
    %93 = arith.mulf %91, %92 : vector<8x256xf32>
    %c0_i32_149 = arith.constant 0 : i32
    %c0_i32_150 = arith.constant 0 : i32
    %c0_i32_151 = arith.constant 0 : i32
    %94 = tpu.memref_slice %arg1[%c0_i32_149, %c0_i32_150, %c0_i32_151] : memref<1x4x256xf32, #tpu.memory_space<vmem>> -> memref<1x4x256xf32, #tpu.memory_space<vmem>>
    %95 = tpu.memref_squeeze %94 : memref<1x4x256xf32, #tpu.memory_space<vmem>> -> memref<4x256xf32, #tpu.memory_space<vmem>>
    %c1_152 = arith.constant 1 : index
    %c0_153 = arith.constant 0 : index
    %96 = vector.load %95[%c1_152, %c0_153] : memref<4x256xf32, #tpu.memory_space<vmem>>, vector<1x256xf32>
    %c16_i32_154 = arith.constant 16 : i32
    %97 = tpu.dynamic_rotate %96 by %c16_i32_154 dim 1 : vector<1x256xf32>, i32 -> vector<1x256xf32>
    %c1_i32_155 = arith.constant 1 : i32
    %98 = tpu.dynamic_rotate %97 by %c1_i32_155 dim 1 : vector<1x256xf32>, i32 -> vector<1x256xf32>
    %c255_i32_156 = arith.constant 255 : i32
    %99 = tpu.dynamic_rotate %97 by %c255_i32_156 dim 1 : vector<1x256xf32>, i32 -> vector<1x256xf32>
    %100 = vector.broadcast %12 : vector<8x1xf32> to vector<8x256xf32>
    %101 = vector.broadcast %97 : vector<1x256xf32> to vector<8x256xf32>
    %102 = arith.mulf %100, %101 : vector<8x256xf32>
    %103 = arith.addf %87, %102 : vector<8x256xf32>
    %104 = vector.broadcast %4 : vector<8x1xf32> to vector<8x256xf32>
    %105 = vector.broadcast %98 : vector<1x256xf32> to vector<8x256xf32>
    %106 = arith.mulf %104, %105 : vector<8x256xf32>
    %107 = arith.addf %90, %106 : vector<8x256xf32>
    %108 = vector.broadcast %20 : vector<8x1xf32> to vector<8x256xf32>
    %109 = vector.broadcast %99 : vector<1x256xf32> to vector<8x256xf32>
    %110 = arith.mulf %108, %109 : vector<8x256xf32>
    %111 = arith.addf %93, %110 : vector<8x256xf32>
    %c0_i32_157 = arith.constant 0 : i32
    %c0_i32_158 = arith.constant 0 : i32
    %c0_i32_159 = arith.constant 0 : i32
    %112 = tpu.memref_slice %arg1[%c0_i32_157, %c0_i32_158, %c0_i32_159] : memref<1x4x256xf32, #tpu.memory_space<vmem>> -> memref<1x4x256xf32, #tpu.memory_space<vmem>>
    %113 = tpu.memref_squeeze %112 : memref<1x4x256xf32, #tpu.memory_space<vmem>> -> memref<4x256xf32, #tpu.memory_space<vmem>>
    %c2_160 = arith.constant 2 : index
    %c0_161 = arith.constant 0 : index
    %114 = vector.load %113[%c2_160, %c0_161] : memref<4x256xf32, #tpu.memory_space<vmem>>, vector<1x256xf32>
    %c16_i32_162 = arith.constant 16 : i32
    %115 = tpu.dynamic_rotate %114 by %c16_i32_162 dim 1 : vector<1x256xf32>, i32 -> vector<1x256xf32>
    %c1_i32_163 = arith.constant 1 : i32
    %116 = tpu.dynamic_rotate %115 by %c1_i32_163 dim 1 : vector<1x256xf32>, i32 -> vector<1x256xf32>
    %c255_i32_164 = arith.constant 255 : i32
    %117 = tpu.dynamic_rotate %115 by %c255_i32_164 dim 1 : vector<1x256xf32>, i32 -> vector<1x256xf32>
    %118 = vector.broadcast %14 : vector<8x1xf32> to vector<8x256xf32>
    %119 = vector.broadcast %115 : vector<1x256xf32> to vector<8x256xf32>
    %120 = arith.mulf %118, %119 : vector<8x256xf32>
    %121 = arith.addf %103, %120 : vector<8x256xf32>
    %122 = vector.broadcast %6 : vector<8x1xf32> to vector<8x256xf32>
    %123 = vector.broadcast %116 : vector<1x256xf32> to vector<8x256xf32>
    %124 = arith.mulf %122, %123 : vector<8x256xf32>
    %125 = arith.addf %107, %124 : vector<8x256xf32>
    %126 = vector.broadcast %22 : vector<8x1xf32> to vector<8x256xf32>
    %127 = vector.broadcast %117 : vector<1x256xf32> to vector<8x256xf32>
    %128 = arith.mulf %126, %127 : vector<8x256xf32>
    %129 = arith.addf %111, %128 : vector<8x256xf32>
    %c0_i32_165 = arith.constant 0 : i32
    %c0_i32_166 = arith.constant 0 : i32
    %c0_i32_167 = arith.constant 0 : i32
    %130 = tpu.memref_slice %arg1[%c0_i32_165, %c0_i32_166, %c0_i32_167] : memref<1x4x256xf32, #tpu.memory_space<vmem>> -> memref<1x4x256xf32, #tpu.memory_space<vmem>>
    %131 = tpu.memref_squeeze %130 : memref<1x4x256xf32, #tpu.memory_space<vmem>> -> memref<4x256xf32, #tpu.memory_space<vmem>>
    %c3_168 = arith.constant 3 : index
    %c0_169 = arith.constant 0 : index
    %132 = vector.load %131[%c3_168, %c0_169] : memref<4x256xf32, #tpu.memory_space<vmem>>, vector<1x256xf32>
    %c16_i32_170 = arith.constant 16 : i32
    %133 = tpu.dynamic_rotate %132 by %c16_i32_170 dim 1 : vector<1x256xf32>, i32 -> vector<1x256xf32>
    %c1_i32_171 = arith.constant 1 : i32
    %134 = tpu.dynamic_rotate %133 by %c1_i32_171 dim 1 : vector<1x256xf32>, i32 -> vector<1x256xf32>
    %c255_i32_172 = arith.constant 255 : i32
    %135 = tpu.dynamic_rotate %133 by %c255_i32_172 dim 1 : vector<1x256xf32>, i32 -> vector<1x256xf32>
    %136 = vector.broadcast %16 : vector<8x1xf32> to vector<8x256xf32>
    %137 = vector.broadcast %133 : vector<1x256xf32> to vector<8x256xf32>
    %138 = arith.mulf %136, %137 : vector<8x256xf32>
    %139 = arith.addf %121, %138 : vector<8x256xf32>
    %140 = vector.broadcast %8 : vector<8x1xf32> to vector<8x256xf32>
    %141 = vector.broadcast %134 : vector<1x256xf32> to vector<8x256xf32>
    %142 = arith.mulf %140, %141 : vector<8x256xf32>
    %143 = arith.addf %125, %142 : vector<8x256xf32>
    %144 = vector.broadcast %24 : vector<8x1xf32> to vector<8x256xf32>
    %145 = vector.broadcast %135 : vector<1x256xf32> to vector<8x256xf32>
    %146 = arith.mulf %144, %145 : vector<8x256xf32>
    %147 = arith.addf %129, %146 : vector<8x256xf32>
    %c0_i32_173 = arith.constant 0 : i32
    %c0_i32_174 = arith.constant 0 : i32
    %c0_i32_175 = arith.constant 0 : i32
    %148 = tpu.memref_slice %arg1[%c0_i32_173, %c0_i32_174, %c0_i32_175] : memref<1x4x256xf32, #tpu.memory_space<vmem>> -> memref<1x4x256xf32, #tpu.memory_space<vmem>>
    %149 = tpu.memref_squeeze %148 : memref<1x4x256xf32, #tpu.memory_space<vmem>> -> memref<4x256xf32, #tpu.memory_space<vmem>>
    %c0_176 = arith.constant 0 : index
    %c0_177 = arith.constant 0 : index
    %150 = vector.load %149[%c0_176, %c0_177] : memref<4x256xf32, #tpu.memory_space<vmem>>, vector<1x256xf32>
    %c1_i32_178 = arith.constant 1 : i32
    %151 = tpu.dynamic_rotate %150 by %c1_i32_178 dim 1 : vector<1x256xf32>, i32 -> vector<1x256xf32>
    %c255_i32_179 = arith.constant 255 : i32
    %152 = tpu.dynamic_rotate %150 by %c255_i32_179 dim 1 : vector<1x256xf32>, i32 -> vector<1x256xf32>
    %153 = vector.broadcast %34 : vector<8x1xf32> to vector<8x256xf32>
    %154 = vector.broadcast %150 : vector<1x256xf32> to vector<8x256xf32>
    %155 = arith.mulf %153, %154 : vector<8x256xf32>
    %156 = arith.addf %74, %155 : vector<8x256xf32>
    %157 = vector.broadcast %26 : vector<8x1xf32> to vector<8x256xf32>
    %158 = vector.broadcast %151 : vector<1x256xf32> to vector<8x256xf32>
    %159 = arith.mulf %157, %158 : vector<8x256xf32>
    %160 = vector.broadcast %42 : vector<8x1xf32> to vector<8x256xf32>
    %161 = vector.broadcast %152 : vector<1x256xf32> to vector<8x256xf32>
    %162 = arith.mulf %160, %161 : vector<8x256xf32>
    %c0_i32_180 = arith.constant 0 : i32
    %c0_i32_181 = arith.constant 0 : i32
    %c0_i32_182 = arith.constant 0 : i32
    %163 = tpu.memref_slice %arg1[%c0_i32_180, %c0_i32_181, %c0_i32_182] : memref<1x4x256xf32, #tpu.memory_space<vmem>> -> memref<1x4x256xf32, #tpu.memory_space<vmem>>
    %164 = tpu.memref_squeeze %163 : memref<1x4x256xf32, #tpu.memory_space<vmem>> -> memref<4x256xf32, #tpu.memory_space<vmem>>
    %c1_183 = arith.constant 1 : index
    %c0_184 = arith.constant 0 : index
    %165 = vector.load %164[%c1_183, %c0_184] : memref<4x256xf32, #tpu.memory_space<vmem>>, vector<1x256xf32>
    %c1_i32_185 = arith.constant 1 : i32
    %166 = tpu.dynamic_rotate %165 by %c1_i32_185 dim 1 : vector<1x256xf32>, i32 -> vector<1x256xf32>
    %c255_i32_186 = arith.constant 255 : i32
    %167 = tpu.dynamic_rotate %165 by %c255_i32_186 dim 1 : vector<1x256xf32>, i32 -> vector<1x256xf32>
    %168 = vector.broadcast %36 : vector<8x1xf32> to vector<8x256xf32>
    %169 = vector.broadcast %165 : vector<1x256xf32> to vector<8x256xf32>
    %170 = arith.mulf %168, %169 : vector<8x256xf32>
    %171 = arith.addf %156, %170 : vector<8x256xf32>
    %172 = vector.broadcast %28 : vector<8x1xf32> to vector<8x256xf32>
    %173 = vector.broadcast %166 : vector<1x256xf32> to vector<8x256xf32>
    %174 = arith.mulf %172, %173 : vector<8x256xf32>
    %175 = arith.addf %159, %174 : vector<8x256xf32>
    %176 = vector.broadcast %44 : vector<8x1xf32> to vector<8x256xf32>
    %177 = vector.broadcast %167 : vector<1x256xf32> to vector<8x256xf32>
    %178 = arith.mulf %176, %177 : vector<8x256xf32>
    %179 = arith.addf %162, %178 : vector<8x256xf32>
    %c0_i32_187 = arith.constant 0 : i32
    %c0_i32_188 = arith.constant 0 : i32
    %c0_i32_189 = arith.constant 0 : i32
    %180 = tpu.memref_slice %arg1[%c0_i32_187, %c0_i32_188, %c0_i32_189] : memref<1x4x256xf32, #tpu.memory_space<vmem>> -> memref<1x4x256xf32, #tpu.memory_space<vmem>>
    %181 = tpu.memref_squeeze %180 : memref<1x4x256xf32, #tpu.memory_space<vmem>> -> memref<4x256xf32, #tpu.memory_space<vmem>>
    %c2_190 = arith.constant 2 : index
    %c0_191 = arith.constant 0 : index
    %182 = vector.load %181[%c2_190, %c0_191] : memref<4x256xf32, #tpu.memory_space<vmem>>, vector<1x256xf32>
    %c1_i32_192 = arith.constant 1 : i32
    %183 = tpu.dynamic_rotate %182 by %c1_i32_192 dim 1 : vector<1x256xf32>, i32 -> vector<1x256xf32>
    %c255_i32_193 = arith.constant 255 : i32
    %184 = tpu.dynamic_rotate %182 by %c255_i32_193 dim 1 : vector<1x256xf32>, i32 -> vector<1x256xf32>
    %185 = vector.broadcast %38 : vector<8x1xf32> to vector<8x256xf32>
    %186 = vector.broadcast %182 : vector<1x256xf32> to vector<8x256xf32>
    %187 = arith.mulf %185, %186 : vector<8x256xf32>
    %188 = arith.addf %171, %187 : vector<8x256xf32>
    %189 = vector.broadcast %30 : vector<8x1xf32> to vector<8x256xf32>
    %190 = vector.broadcast %183 : vector<1x256xf32> to vector<8x256xf32>
    %191 = arith.mulf %189, %190 : vector<8x256xf32>
    %192 = arith.addf %175, %191 : vector<8x256xf32>
    %193 = vector.broadcast %46 : vector<8x1xf32> to vector<8x256xf32>
    %194 = vector.broadcast %184 : vector<1x256xf32> to vector<8x256xf32>
    %195 = arith.mulf %193, %194 : vector<8x256xf32>
    %196 = arith.addf %179, %195 : vector<8x256xf32>
    %c0_i32_194 = arith.constant 0 : i32
    %c0_i32_195 = arith.constant 0 : i32
    %c0_i32_196 = arith.constant 0 : i32
    %197 = tpu.memref_slice %arg1[%c0_i32_194, %c0_i32_195, %c0_i32_196] : memref<1x4x256xf32, #tpu.memory_space<vmem>> -> memref<1x4x256xf32, #tpu.memory_space<vmem>>
    %198 = tpu.memref_squeeze %197 : memref<1x4x256xf32, #tpu.memory_space<vmem>> -> memref<4x256xf32, #tpu.memory_space<vmem>>
    %c3_197 = arith.constant 3 : index
    %c0_198 = arith.constant 0 : index
    %199 = vector.load %198[%c3_197, %c0_198] : memref<4x256xf32, #tpu.memory_space<vmem>>, vector<1x256xf32>
    %c1_i32_199 = arith.constant 1 : i32
    %200 = tpu.dynamic_rotate %199 by %c1_i32_199 dim 1 : vector<1x256xf32>, i32 -> vector<1x256xf32>
    %c255_i32_200 = arith.constant 255 : i32
    %201 = tpu.dynamic_rotate %199 by %c255_i32_200 dim 1 : vector<1x256xf32>, i32 -> vector<1x256xf32>
    %202 = vector.broadcast %40 : vector<8x1xf32> to vector<8x256xf32>
    %203 = vector.broadcast %199 : vector<1x256xf32> to vector<8x256xf32>
    %204 = arith.mulf %202, %203 : vector<8x256xf32>
    %205 = arith.addf %188, %204 : vector<8x256xf32>
    %206 = vector.broadcast %32 : vector<8x1xf32> to vector<8x256xf32>
    %207 = vector.broadcast %200 : vector<1x256xf32> to vector<8x256xf32>
    %208 = arith.mulf %206, %207 : vector<8x256xf32>
    %209 = arith.addf %192, %208 : vector<8x256xf32>
    %210 = vector.broadcast %48 : vector<8x1xf32> to vector<8x256xf32>
    %211 = vector.broadcast %201 : vector<1x256xf32> to vector<8x256xf32>
    %212 = arith.mulf %210, %211 : vector<8x256xf32>
    %213 = arith.addf %196, %212 : vector<8x256xf32>
    %c0_i32_201 = arith.constant 0 : i32
    %c0_i32_202 = arith.constant 0 : i32
    %c0_i32_203 = arith.constant 0 : i32
    %214 = tpu.memref_slice %arg1[%c0_i32_201, %c0_i32_202, %c0_i32_203] : memref<1x4x256xf32, #tpu.memory_space<vmem>> -> memref<1x4x256xf32, #tpu.memory_space<vmem>>
    %215 = tpu.memref_squeeze %214 : memref<1x4x256xf32, #tpu.memory_space<vmem>> -> memref<4x256xf32, #tpu.memory_space<vmem>>
    %c0_204 = arith.constant 0 : index
    %c0_205 = arith.constant 0 : index
    %216 = vector.load %215[%c0_204, %c0_205] : memref<4x256xf32, #tpu.memory_space<vmem>>, vector<1x256xf32>
    %c240_i32 = arith.constant 240 : i32
    %217 = tpu.dynamic_rotate %216 by %c240_i32 dim 1 : vector<1x256xf32>, i32 -> vector<1x256xf32>
    %c1_i32_206 = arith.constant 1 : i32
    %218 = tpu.dynamic_rotate %217 by %c1_i32_206 dim 1 : vector<1x256xf32>, i32 -> vector<1x256xf32>
    %c255_i32_207 = arith.constant 255 : i32
    %219 = tpu.dynamic_rotate %217 by %c255_i32_207 dim 1 : vector<1x256xf32>, i32 -> vector<1x256xf32>
    %220 = vector.broadcast %58 : vector<8x1xf32> to vector<8x256xf32>
    %221 = vector.broadcast %217 : vector<1x256xf32> to vector<8x256xf32>
    %222 = arith.mulf %220, %221 : vector<8x256xf32>
    %223 = vector.broadcast %50 : vector<8x1xf32> to vector<8x256xf32>
    %224 = vector.broadcast %218 : vector<1x256xf32> to vector<8x256xf32>
    %225 = arith.mulf %223, %224 : vector<8x256xf32>
    %226 = vector.broadcast %66 : vector<8x1xf32> to vector<8x256xf32>
    %227 = vector.broadcast %219 : vector<1x256xf32> to vector<8x256xf32>
    %228 = arith.mulf %226, %227 : vector<8x256xf32>
    %c0_i32_208 = arith.constant 0 : i32
    %c0_i32_209 = arith.constant 0 : i32
    %c0_i32_210 = arith.constant 0 : i32
    %229 = tpu.memref_slice %arg1[%c0_i32_208, %c0_i32_209, %c0_i32_210] : memref<1x4x256xf32, #tpu.memory_space<vmem>> -> memref<1x4x256xf32, #tpu.memory_space<vmem>>
    %230 = tpu.memref_squeeze %229 : memref<1x4x256xf32, #tpu.memory_space<vmem>> -> memref<4x256xf32, #tpu.memory_space<vmem>>
    %c1_211 = arith.constant 1 : index
    %c0_212 = arith.constant 0 : index
    %231 = vector.load %230[%c1_211, %c0_212] : memref<4x256xf32, #tpu.memory_space<vmem>>, vector<1x256xf32>
    %c240_i32_213 = arith.constant 240 : i32
    %232 = tpu.dynamic_rotate %231 by %c240_i32_213 dim 1 : vector<1x256xf32>, i32 -> vector<1x256xf32>
    %c1_i32_214 = arith.constant 1 : i32
    %233 = tpu.dynamic_rotate %232 by %c1_i32_214 dim 1 : vector<1x256xf32>, i32 -> vector<1x256xf32>
    %c255_i32_215 = arith.constant 255 : i32
    %234 = tpu.dynamic_rotate %232 by %c255_i32_215 dim 1 : vector<1x256xf32>, i32 -> vector<1x256xf32>
    %235 = vector.broadcast %60 : vector<8x1xf32> to vector<8x256xf32>
    %236 = vector.broadcast %232 : vector<1x256xf32> to vector<8x256xf32>
    %237 = arith.mulf %235, %236 : vector<8x256xf32>
    %238 = arith.addf %222, %237 : vector<8x256xf32>
    %239 = vector.broadcast %52 : vector<8x1xf32> to vector<8x256xf32>
    %240 = vector.broadcast %233 : vector<1x256xf32> to vector<8x256xf32>
    %241 = arith.mulf %239, %240 : vector<8x256xf32>
    %242 = arith.addf %225, %241 : vector<8x256xf32>
    %243 = vector.broadcast %68 : vector<8x1xf32> to vector<8x256xf32>
    %244 = vector.broadcast %234 : vector<1x256xf32> to vector<8x256xf32>
    %245 = arith.mulf %243, %244 : vector<8x256xf32>
    %246 = arith.addf %228, %245 : vector<8x256xf32>
    %c0_i32_216 = arith.constant 0 : i32
    %c0_i32_217 = arith.constant 0 : i32
    %c0_i32_218 = arith.constant 0 : i32
    %247 = tpu.memref_slice %arg1[%c0_i32_216, %c0_i32_217, %c0_i32_218] : memref<1x4x256xf32, #tpu.memory_space<vmem>> -> memref<1x4x256xf32, #tpu.memory_space<vmem>>
    %248 = tpu.memref_squeeze %247 : memref<1x4x256xf32, #tpu.memory_space<vmem>> -> memref<4x256xf32, #tpu.memory_space<vmem>>
    %c2_219 = arith.constant 2 : index
    %c0_220 = arith.constant 0 : index
    %249 = vector.load %248[%c2_219, %c0_220] : memref<4x256xf32, #tpu.memory_space<vmem>>, vector<1x256xf32>
    %c240_i32_221 = arith.constant 240 : i32
    %250 = tpu.dynamic_rotate %249 by %c240_i32_221 dim 1 : vector<1x256xf32>, i32 -> vector<1x256xf32>
    %c1_i32_222 = arith.constant 1 : i32
    %251 = tpu.dynamic_rotate %250 by %c1_i32_222 dim 1 : vector<1x256xf32>, i32 -> vector<1x256xf32>
    %c255_i32_223 = arith.constant 255 : i32
    %252 = tpu.dynamic_rotate %250 by %c255_i32_223 dim 1 : vector<1x256xf32>, i32 -> vector<1x256xf32>
    %253 = vector.broadcast %62 : vector<8x1xf32> to vector<8x256xf32>
    %254 = vector.broadcast %250 : vector<1x256xf32> to vector<8x256xf32>
    %255 = arith.mulf %253, %254 : vector<8x256xf32>
    %256 = arith.addf %238, %255 : vector<8x256xf32>
    %257 = vector.broadcast %54 : vector<8x1xf32> to vector<8x256xf32>
    %258 = vector.broadcast %251 : vector<1x256xf32> to vector<8x256xf32>
    %259 = arith.mulf %257, %258 : vector<8x256xf32>
    %260 = arith.addf %242, %259 : vector<8x256xf32>
    %261 = vector.broadcast %70 : vector<8x1xf32> to vector<8x256xf32>
    %262 = vector.broadcast %252 : vector<1x256xf32> to vector<8x256xf32>
    %263 = arith.mulf %261, %262 : vector<8x256xf32>
    %264 = arith.addf %246, %263 : vector<8x256xf32>
    %c0_i32_224 = arith.constant 0 : i32
    %c0_i32_225 = arith.constant 0 : i32
    %c0_i32_226 = arith.constant 0 : i32
    %265 = tpu.memref_slice %arg1[%c0_i32_224, %c0_i32_225, %c0_i32_226] : memref<1x4x256xf32, #tpu.memory_space<vmem>> -> memref<1x4x256xf32, #tpu.memory_space<vmem>>
    %266 = tpu.memref_squeeze %265 : memref<1x4x256xf32, #tpu.memory_space<vmem>> -> memref<4x256xf32, #tpu.memory_space<vmem>>
    %c3_227 = arith.constant 3 : index
    %c0_228 = arith.constant 0 : index
    %267 = vector.load %266[%c3_227, %c0_228] : memref<4x256xf32, #tpu.memory_space<vmem>>, vector<1x256xf32>
    %c240_i32_229 = arith.constant 240 : i32
    %268 = tpu.dynamic_rotate %267 by %c240_i32_229 dim 1 : vector<1x256xf32>, i32 -> vector<1x256xf32>
    %c1_i32_230 = arith.constant 1 : i32
    %269 = tpu.dynamic_rotate %268 by %c1_i32_230 dim 1 : vector<1x256xf32>, i32 -> vector<1x256xf32>
    %c255_i32_231 = arith.constant 255 : i32
    %270 = tpu.dynamic_rotate %268 by %c255_i32_231 dim 1 : vector<1x256xf32>, i32 -> vector<1x256xf32>
    %271 = vector.broadcast %64 : vector<8x1xf32> to vector<8x256xf32>
    %272 = vector.broadcast %268 : vector<1x256xf32> to vector<8x256xf32>
    %273 = arith.mulf %271, %272 : vector<8x256xf32>
    %274 = arith.addf %256, %273 : vector<8x256xf32>
    %275 = vector.broadcast %56 : vector<8x1xf32> to vector<8x256xf32>
    %276 = vector.broadcast %269 : vector<1x256xf32> to vector<8x256xf32>
    %277 = arith.mulf %275, %276 : vector<8x256xf32>
    %278 = arith.addf %260, %277 : vector<8x256xf32>
    %279 = vector.broadcast %72 : vector<8x1xf32> to vector<8x256xf32>
    %280 = vector.broadcast %270 : vector<1x256xf32> to vector<8x256xf32>
    %281 = arith.mulf %279, %280 : vector<8x256xf32>
    %282 = arith.addf %264, %281 : vector<8x256xf32>
    %283 = vector.broadcast %77 : vector<1x256xf32> to vector<8x256xf32>
    %284 = arith.mulf %139, %283 : vector<8x256xf32>
    %285 = arith.addf %205, %284 : vector<8x256xf32>
    %286 = arith.mulf %75, %77 : vector<1x256xf32>
    %287 = vector.broadcast %286 : vector<1x256xf32> to vector<8x256xf32>
    %288 = arith.mulf %143, %287 : vector<8x256xf32>
    %289 = arith.addf %285, %288 : vector<8x256xf32>
    %290 = arith.mulf %76, %77 : vector<1x256xf32>
    %291 = vector.broadcast %290 : vector<1x256xf32> to vector<8x256xf32>
    %292 = arith.mulf %147, %291 : vector<8x256xf32>
    %293 = arith.addf %289, %292 : vector<8x256xf32>
    %294 = vector.broadcast %75 : vector<1x256xf32> to vector<8x256xf32>
    %295 = arith.mulf %209, %294 : vector<8x256xf32>
    %296 = arith.addf %293, %295 : vector<8x256xf32>
    %297 = vector.broadcast %76 : vector<1x256xf32> to vector<8x256xf32>
    %298 = arith.mulf %213, %297 : vector<8x256xf32>
    %299 = arith.addf %296, %298 : vector<8x256xf32>
    %300 = vector.broadcast %78 : vector<1x256xf32> to vector<8x256xf32>
    %301 = arith.mulf %274, %300 : vector<8x256xf32>
    %302 = arith.addf %299, %301 : vector<8x256xf32>
    %303 = arith.mulf %75, %78 : vector<1x256xf32>
    %304 = vector.broadcast %303 : vector<1x256xf32> to vector<8x256xf32>
    %305 = arith.mulf %278, %304 : vector<8x256xf32>
    %306 = arith.addf %302, %305 : vector<8x256xf32>
    %307 = arith.mulf %76, %78 : vector<1x256xf32>
    %308 = vector.broadcast %307 : vector<1x256xf32> to vector<8x256xf32>
    %309 = arith.mulf %282, %308 : vector<8x256xf32>
    %310 = arith.addf %306, %309 : vector<8x256xf32>
    %cst = arith.constant 0.000000e+00 : f32
    %311 = vector.broadcast %cst : f32 to vector<8x256xf32>
    %312 = arith.maximumf %310, %311 : vector<8x256xf32>
    %c0_i32_232 = arith.constant 0 : i32
    %c0_i32_233 = arith.constant 0 : i32
    %c0_i32_234 = arith.constant 0 : i32
    %313 = tpu.memref_slice %arg5[%c0_i32_232, %c0_i32_233, %c0_i32_234] : memref<1x8x256xf32, #tpu.memory_space<vmem>> -> memref<1x8x256xf32, #tpu.memory_space<vmem>>
    %314 = tpu.memref_squeeze %313 : memref<1x8x256xf32, #tpu.memory_space<vmem>> -> memref<8x256xf32, #tpu.memory_space<vmem>>
    %c0_235 = arith.constant 0 : index
    %c0_236 = arith.constant 0 : index
    %315 = vector.load %314[%c0_235, %c0_236] : memref<8x256xf32, #tpu.memory_space<vmem>>, vector<8x256xf32>
    tpu.vector_store %314[%c0_235, %c0_236], %312 {strides = array<i32>} : memref<8x256xf32, #tpu.memory_space<vmem>>, vector<8x256xf32>,
    return
  }
  func.func @transform_0(%arg0: i32) -> (i32, i32, i32) {
    %c0_i32 = arith.constant 0 : i32
    %c0_i32_0 = arith.constant 0 : i32
    %c0_i32_1 = arith.constant 0 : i32
    return %arg0, %c0_i32, %c0_i32_0 : i32, i32, i32
  }
  func.func @transform_1(%arg0: i32) -> (i32, i32, i32, i32) {
    %c0_i32 = arith.constant 0 : i32
    %c0_i32_0 = arith.constant 0 : i32
    %c0_i32_1 = arith.constant 0 : i32
    %c0_i32_2 = arith.constant 0 : i32
    %c0_i32_3 = arith.constant 0 : i32
    return %c0_i32, %c0_i32_0, %c0_i32_1, %c0_i32_2 : i32, i32, i32, i32
  }
  func.func @transform_2(%arg0: i32) -> (i32, i32) {
    %c0_i32 = arith.constant 0 : i32
    %c0_i32_0 = arith.constant 0 : i32
    %c0_i32_1 = arith.constant 0 : i32
    return %c0_i32, %c0_i32_0 : i32, i32
  }
  func.func @transform_3(%arg0: i32) -> (i32, i32) {
    %c0_i32 = arith.constant 0 : i32
    %c0_i32_0 = arith.constant 0 : i32
    %c0_i32_1 = arith.constant 0 : i32
    return %c0_i32, %c0_i32_0 : i32, i32
  }
  func.func @transform_4(%arg0: i32) -> (i32, i32, i32) {
    %c0_i32 = arith.constant 0 : i32
    %c0_i32_0 = arith.constant 0 : i32
    %c0_i32_1 = arith.constant 0 : i32
    return %arg0, %c0_i32, %c0_i32_0 : i32, i32, i32
  }
}

</mosaic_0001>

<bundles_post_ra>
// kernel: tpu_custom_call.1
= control target key start
LH: loop header
LB: loop body
LE: loop exit
PB: predicated region body
PF: predicated region fallthrough
CT: control target
= control target key end

     0   :  { %9 = vsyncpa [#allocation3], 0  ;;  %s1821_s0 = inlined_call_operand.vmem [shape: f32[2,4,256], index: 0, kind: input, shape index: {}]   ;;  %s1822_s1 = inlined_call_operand.vmem [shape: f32[9,4,8,1], index: 1, kind: input, shape index: {}]   ;;  %s1823_s2 = inlined_call_operand.vmem [shape: f32[8,1], index: 2, kind: input, shape index: {}]   ;;  %s1824_s3 = inlined_call_operand.vmem [shape: f32[4,256], index: 3, kind: input, shape index: {}]   ;;  %s1825_s4 = inlined_call_operand.hbm [shape: f32[2,8,256], index: 4, kind: output, shape index: {}]  }
   0x1   :  { %11 = vsyncpa [#allocation3 + $0x1], 0  ;;  %s1229_s15 = smov 0   ;;  %s1231_s16 = smov 0  }
   0x2   :  { %s1233_s17 = smov 0   ;;  %s1235_s18 = smov 0  }
   0x3 LB: > { %s1250_s19 = sadd.s32 4294967295, %s1197_s18   ;;  %s1033_s20 = sadd.s32 4294967294, %s1197_s18   ;;  %s1197_s18 = sphi %s1235_s18, %s1831_s18   ;;  %s1193_s17 = sphi %s1233_s17, %s1830_s17   ;;  %s1189_s16 = sphi %s1231_s16, %s1829_s16   ;;  %s1185_s15 = sphi %s1229_s15, %s1828_s15  }
   0x4   : > { %s1254_s21 = sadd.s32 1, %s1197_s18   ;;  %s113_s22 = sadd.s32 1, %s1193_s17 }
   0x5   : > { %s110_s23 = ssub.s32 %s1197_s18, %s1254_s21  ;;  %p123_p0 = scmp.ne.s32.totalorder %s1193_s17, %s1189_s16 }
   0x6   : > { %p111_p1 = scmp.eq.s32.totalorder %s110_s23, 0  ;;  %p124_p2 = scmp.eq.s32.totalorder %s1250_s19, 1 }
   0x7   : > { %p129_p3 = scmp.ne.s32.totalorder %s1189_s16, %s1185_s15  ;;  %p130_p4 = scmp.eq.s32.totalorder %s1033_s20, 1 }
   0x8   : > { %s1265_s24 = scalar_select %p111_p1, %s1193_s17, %s113_s22  }
   0x9   : > { %p1267_p5 = por %p124_p2, %p123_p0  ;;  %p1271_p6 = por %p130_p4, %p129_p3 }
   0xa   : > { %p1036_p7 = scmp.ge.s32.totalorder %s1197_s18, 1  ;;  %p165_p8 = scmp.lt.s32.totalorder %s1197_s18, 3 }
   0xc   : > { %p166_p9 = pnand %p1036_p7, %p165_p8 }
   0xd   : > { %p191_p10 = scmp.lt.s32.totalorder (!%p166_p9), %s1250_s19, 1  ;;  %s1200_s12 = smov (!%p166_p9), 16  }
   0xe   : > { %169 = sbr.rel (%p166_p9) target bundleno = 785 (0x311), region = 36  ;;  %s1202_s29 = smov (!%p166_p9), 1  }
   0xf   : > { %s1087_s22 = sshll.u32 (!%p166_p9), %s1250_s19, 4  ;;  %s1155_s10 = scalar_lea.hbm (!%p166_p9), %s1825_s4, 32 }
  0x10   : > { %s969_s27 = scalar_lea.hbm (!%p166_p9), %s1825_s4, %s1087_s22 }
  0x11   : > { %s973_s30 = sshll.u32 (!%p166_p9), %s969_s27, 4  ;;  %s974_s30 = int_to_ptr.hbm [resolvable:$true] %s973_s30 }
  0x12   : > { %s1149_s5 = sshra.s32 (!%p166_p9), %s974_s30, 4  ;;  %s1150_s5 = int_to_ptr.hbm [resolvable:$true] %s1149_s5 }
  0x13   : > { %v1043_v0 = vld [vmem:[%s1822_s1 + $0x20] sm:$0xff]  ;;  %v1199_v3 = vmov 0   ;;  %s192_s7 = scalar_select %p191_p10, %s1250_s19, 1  ;;  %v1040_v10 = vld [vmem:[%s1822_s1 + $0x8] sm:$0xff]  ;;  %v1041_v17 = vld [vmem:[%s1822_s1 + $0x10] sm:$0xff]  ;;  %v290_v32 = vlaneseq }
  0x14   : > { %v197_v1 = vld [vmem:[%s1822_s1] sm:$0xff]  ;;  %1134 = vset.pattern.permute.xlu2 %v1199_v3  ;;  %1133 = vset.pattern.permute.xlu1 %v1199_v3  ;;  %v1044_v14 = vld [vmem:[%s1822_s1 + $0x28] sm:$0xff]  ;;  %v1049_v18 = vld [vmem:[%s1822_s1 + $0x50] sm:$0xff]  ;;  %s1151_s6 = scalar_lea.hbm %s1150_s5, 16  ;;  %p1156_p0 = scmp.lt.s32.totalorder %s1150_s5, %s1825_s4 }
  0x15   : > { %v196_v2 = vld [vmem:[%s1823_s2] sm:$0xff]  ;;  %1132 = vset.pattern.permute.xlu0 %v1199_v3  ;;  %311 = vperm.xlu1 %1133, %v1043_v0   ;;  %s1086_s8 = sshll.u32 %s192_s7, 3  ;;  %v1048_v15 = vld [vmem:[%s1822_s1 + $0x48] sm:$0xff]  ;;  %v1045_v21 = vld [vmem:[%s1822_s1 + $0x30] sm:$0xff]  ;;  %v1382_v36 = vand.u32 127, %v290_v32  ;;  %p1152_p11 = scmp.ne.s32.totalorder %s1150_s5, %s1151_s6 }
  0x16   : > { %320 = vperm.xlu2 %1134, %v197_v1   ;;  %270 = vperm.xlu0 %1132, %v196_v2   ;;  %s195_s11 = scalar_lea.vmem %s1821_s0, %s1086_s8  ;;  %v1047_v11 = vld [vmem:[%s1822_s1 + $0x40] sm:$0xff]  ;;  %v1050_v22 = vld [vmem:[%s1822_s1 + $0x58] sm:$0xff]  ;;  %s1203_s8 = smov 112  }
  0x17   : > { %v1078_v4 = vld [vmem:[%s195_s11 + $0x1] ss:$4 sm:$0x3]  ;;  %v280_v5 = vld [vmem:[%s195_s11] ss:$4 sm:$0x3]  ;;  %p1153_p12 = pnand %p1152_p11, %p1267_p5  ;;  %p1157_p1 = scmp.lt.s32.totalorder %s1155_s10, %s1151_s6 }
  0x18   : > { %v1291_v6 = vperm.slane %v1078_v4, 1  ;;  %v1293_v7 = vperm.slane %v280_v5, 1  ;;  %v1295_v8 = vperm.slane %v280_v5, 0  ;;  %v1303_v9 = vperm.slane %v1078_v4, 0  ;;  %v1042_v24 = vld [vmem:[%s1822_s1 + $0x18] sm:$0xff]  ;;  %v1051_v26 = vld [vmem:[%s1822_s1 + $0x60] sm:$0xff] }
  0x19   : > { %v1079_v12 = vld [vmem:[%s195_s11 + $0x2] ss:$4 sm:$0x3]  ;;  %v1080_v19 = vld [vmem:[%s195_s11 + $0x3] ss:$4 sm:$0x3]  ;;  %p1154_p13 = pneg %p1153_p12  ;;  %p1158_p2 = por %p1157_p1, %p1156_p0 }
  0x1a   : > { %v1313_v13 = vperm.slane %v1079_v12, 1  ;;  %v1323_v16 = vperm.slane %v1079_v12, 0  ;;  %v1333_v20 = vperm.slane %v1080_v19, 1  ;;  %v1343_v23 = vperm.slane %v1080_v19, 0  ;;  %s1201_s11 = smov 127   ;;  %v1046_v25 = vld [vmem:[%s1822_s1 + $0x38] sm:$0xff] }
  0x1b   : > { %v1055_v27 = vld [vmem:[%s1822_s1 + $0x80] sm:$0xff]  ;;  %vm292_vm0 = vcmp.lt.s32.totalorder %v1382_v36, 16  ;;  %vm299_vm1 = vcmp.lt.s32.totalorder %v1382_v36, 1  ;;  %vm306_vm2 = vcmp.lt.s32.totalorder %v1382_v36, 127  ;;  %vm682_vm3 = vcmp.lt.s32.totalorder %v1382_v36, 112  ;;  %p1159_p3 = pnand %p1158_p2, %p1154_p13 }
  0x1c   : > { %v1059_v28 = vld [vmem:[%s1822_s1 + $0xa0] sm:$0xff] }
  0x1d   : > { %288 = vrot.lane.b32.xlu1 %v1293_v7, %s1200_s12 }
  0x1e   : > { %345 = vrot.lane.b32.xlu2 %v1291_v6, %s1200_s12  ;;  %286 = vrot.lane.b32.xlu0 %v1295_v8, %s1200_s12 }
  0x25   : > { %343 = vrot.lane.b32.xlu1 %v1303_v9, %s1200_s12 }
  0x26   : > { %374 = vperm.xlu2 %1134, %v1040_v10   ;;  %329 = vperm.xlu0 %1132, %v1047_v11  }
  0x2d   : > { %363 = vperm.xlu1 %1133, %v1044_v14  }
  0x2e   : > { %403 = vrot.lane.b32.xlu2 %v1313_v13, %s1200_s12  ;;  %385 = vperm.xlu0 %1132, %v1048_v15  }
  0x35   : > { %401 = vrot.lane.b32.xlu1 %v1323_v16, %s1200_s12 }
  0x36   : > { %432 = vperm.xlu2 %1134, %v1041_v17   ;;  %443 = vperm.xlu0 %1132, %v1049_v18  }
  0x3d   : > { %421 = vperm.xlu1 %1133, %v1045_v21  }
  0x3e   : > { %461 = vrot.lane.b32.xlu2 %v1333_v20, %s1200_s12  ;;  %501 = vperm.xlu0 %1132, %v1050_v22  }
  0x45   : > { %459 = vrot.lane.b32.xlu1 %v1343_v23, %s1200_s12 }
  0x46   : > { %490 = vperm.xlu2 %1134, %v1042_v24   ;;  %516 = vrot.lane.b32.xlu0 %v1295_v8, %s1201_s11 }
  0x4d   : > { %479 = vperm.xlu1 %1133, %v1046_v25  }
  0x4e   : > { %512 = vrot.lane.b32.xlu2 %v1293_v7, %s1202_s29  ;;  %533 = vperm.xlu0 %1132, %v1051_v26  }
  0x55   : > { %510 = vrot.lane.b32.xlu1 %v1295_v8, %s1202_s29 }
  0x56   : > { %524 = vperm.xlu2 %1134, %v1055_v27   ;;  %551 = vrot.lane.b32.xlu0 %v1291_v6, %s1202_s29  ;;  %v1052_v27 = vld [vmem:[%s1822_s1 + $0x68] sm:$0xff] }
  0x5d   : > { %518 = vrot.lane.b32.xlu1 %v1293_v7, %s1201_s11 }
  0x5e   : > { %549 = vrot.lane.b32.xlu2 %v1303_v9, %s1202_s29 }
  0x65   : > { %542 = vperm.xlu1 %1133, %v1059_v28   ;;  %v1060_v28 = vld [vmem:[%s1822_s1 + $0xa8] sm:$0xff] }
  0x66   : > { %557 = vrot.lane.b32.xlu2 %v1291_v6, %s1201_s11 }
  0x6d   : > { %555 = vrot.lane.b32.xlu1 %v1303_v9, %s1201_s11 }
  0x70   : > { %v1378_v29 = vpop.permute.xlu2 %320 }
  0x78   : > { %v346_v30 = vpop.permute.xlu2 %345 }
  0x80   : > { %v1380_v31 = vpop.permute.xlu2 %374 }
  0x87   : > { %v312_v33 = vpop.permute.xlu1 %311 }
  0x88   : > { %v271_v34 = vpop.permute.xlu0 %270  ;;  %v404_v35 = vpop.permute.xlu2 %403 }
  0x8f   : > { %v289_v37 = vpop.permute.xlu1 %288 }
  0x90   : > { %v1385_v38 = vpop.permute.xlu2 %432  ;;  %v287_v39 = vpop.permute.xlu0 %286 }
  0x91   : > { %v294_v40 = vsel %vm292_vm0, %v289_v37, %v287_v39  ;;  %v293_v41 = vsel %vm292_vm0, %v287_v39, %v289_v37 }
  0x92   : > { %295 = vrot.lane.b32.xlu1 %v294_v40, %s1202_s29  ;;  %v314_v42 = vperm.slane %v294_v40, 0  ;;  %304 = vrot.lane.b32.xlu0 %v293_v41, %s1201_s11  ;;  %v315_v43 = vperm.slane %v293_v41, 0 }
  0x93   : > { %297 = vrot.lane.b32.xlu2 %v293_v41, %s1202_s29 }
  0x94   : > { %v316_v44 = vmul.f32 %v314_v42, %v312_v33  ;;  %v317_v45 = vmul.f32 %v315_v43, %v312_v33 }
  0x97   : > { %v344_v46 = vpop.permute.xlu1 %343 }
  0x98   : > { %v462_v47 = vpop.permute.xlu2 %461  ;;  %v1394_v48 = vpop.permute.xlu0 %329  ;;  %v347_v49 = vsel %vm292_vm0, %v344_v46, %v346_v30  ;;  %v348_v50 = vsel %vm292_vm0, %v346_v30, %v344_v46 }
  0x99   : > { %v366_v51 = vperm.slane %v348_v50, 0  ;;  %v367_v52 = vperm.slane %v347_v49, 0 }
  0x9a   : > { %351 = vrot.lane.b32.xlu1 %v347_v49, %s1202_s29  ;;  %349 = vrot.lane.b32.xlu0 %v348_v50, %s1202_s29 }
  0x9b   : > { %302 = vrot.lane.b32.xlu2 %v294_v40, %s1201_s11  ;;  %v1056_v40 = vld [vmem:[%s1822_s1 + $0x88] sm:$0xff] }
  0x9f   : > { %v364_v53 = vpop.permute.xlu1 %363 }
  0xa0   : > { %v1403_v54 = vpop.permute.xlu2 %490  ;;  %v368_v55 = vmul.f32 %v366_v51, %v364_v53  ;;  %v369_v56 = vmul.f32 %v367_v52, %v364_v53  ;;  %v1405_v59 = vpop.permute.xlu0 %385 }
  0xa2   : > { %v370_v57 = vadd.f32 %v368_v55, %v316_v44  ;;  %v371_v58 = vadd.f32 %v369_v56, %v317_v45  ;;  %357 = vrot.lane.b32.xlu0 %v347_v49, %s1201_s11  ;;  %v1057_v49 = vld [vmem:[%s1822_s1 + $0x90] sm:$0xff] }
  0xa3   : > { %355 = vrot.lane.b32.xlu2 %v348_v50, %s1201_s11  ;;  %v1053_v50 = vld [vmem:[%s1822_s1 + $0x70] sm:$0xff] }
  0xa7   : > { %v402_v60 = vpop.permute.xlu1 %401 }
  0xa8   : > { %v513_v61 = vpop.permute.xlu2 %512  ;;  %v405_v62 = vsel %vm292_vm0, %v402_v60, %v404_v35  ;;  %v406_v63 = vsel %vm292_vm0, %v404_v35, %v402_v60  ;;  %v1416_v0 = vpop.permute.xlu0 %443 }
  0xa9   : > { %409 = vrot.lane.b32.xlu1 %v405_v62, %s1202_s29  ;;  %v424_v1 = vperm.slane %v406_v63, 0  ;;  %v425_v2 = vperm.slane %v405_v62, 0 }
  0xaa   : > { %407 = vrot.lane.b32.xlu0 %v406_v63, %s1202_s29 }
  0xab   : > { %413 = vrot.lane.b32.xlu2 %v406_v63, %s1201_s11  ;;  %v1058_v63 = vld [vmem:[%s1822_s1 + $0x98] sm:$0xff] }
  0xaf   : > { %v422_v3 = vpop.permute.xlu1 %421 }
  0xb0   : > { %v525_v4 = vpop.permute.xlu2 %524  ;;  %v426_v5 = vmul.f32 %v424_v1, %v422_v3  ;;  %v427_v10 = vmul.f32 %v425_v2, %v422_v3  ;;  %v1425_v19 = vpop.permute.xlu0 %501  ;;  %v1061_v3 = vld [vmem:[%s1822_s1 + $0xb0] sm:$0xff] }
  0xb1   : > { %v527_v11 = vmul.f32 %v525_v4, %v1295_v8  ;;  %v528_v12 = vmul.f32 %v525_v4, %v1293_v7 }
  0xb2   : > { %v428_v14 = vadd.f32 %v426_v5, %v370_v57  ;;  %v429_v15 = vadd.f32 %v427_v10, %v371_v58  ;;  %415 = vrot.lane.b32.xlu0 %v405_v62, %s1201_s11 }
  0xb3   : > { %v1421_v17 = vadd.f32 %v527_v11, %v271_v34  ;;  %v1423_v18 = vadd.f32 %v528_v12, %v271_v34  ;;  %v1062_v12 = vld [vmem:[%s1822_s1 + $0xb8] sm:$0xff] }
  0xb7   : > { %v460_v21 = vpop.permute.xlu1 %459 }
  0xb8   : > { %v463_v22 = vsel %vm292_vm0, %v460_v21, %v462_v47  ;;  %v464_v24 = vsel %vm292_vm0, %v462_v47, %v460_v21  ;;  %v517_v32 = vpop.permute.xlu0 %516  ;;  %v550_v57 = vpop.permute.xlu2 %549 }
  0xb9   : > { %467 = vrot.lane.b32.xlu1 %v463_v22, %s1202_s29  ;;  %471 = vrot.lane.b32.xlu2 %v464_v24, %s1201_s11  ;;  %v482_v25 = vperm.slane %v464_v24, 0  ;;  %v483_v26 = vperm.slane %v463_v22, 0 }
  0xba   : > { %465 = vrot.lane.b32.xlu0 %v464_v24, %s1202_s29 }
  0xbf   : > { %v480_v30 = vpop.permute.xlu1 %479 }
  0xc0   : > { %v484_v33 = vmul.f32 %v482_v25, %v480_v30  ;;  %v485_v34 = vmul.f32 %v483_v26, %v480_v30  ;;  %v534_v45 = vpop.permute.xlu0 %533  ;;  %v558_v4 = vpop.permute.xlu2 %557 }
  0xc1   : > { %572 = vperm.xlu1 %1133, %v1052_v27   ;;  %583 = vperm.xlu2 %1134, %v1060_v28  }
  0xc2   : > { %v1440_v35 = vadd.f32 %v484_v33, %v428_v14  ;;  %v1442_v37 = vadd.f32 %v485_v34, %v429_v15  ;;  %473 = vrot.lane.b32.xlu0 %v463_v22, %s1201_s11  ;;  %v1054_v15 = vld [vmem:[%s1822_s1 + $0x78] sm:$0xff] }
  0xc7   : > { %v511_v39 = vpop.permute.xlu1 %510 }
  0xc8   : > { %v514_v41 = vsel %vm299_vm1, %v511_v39, %v513_v61  ;;  %v515_v42 = vsel %vm299_vm1, %v513_v61, %v511_v39  ;;  %v552_v62 = vpop.permute.xlu0 %551 }
  0xc9   : > { %v536_v43 = vperm.slane %v515_v42, 0  ;;  %v537_v44 = vperm.slane %v514_v41, 0  ;;  %594 = vrot.lane.b32.xlu1 %v1313_v13, %s1202_s29  ;;  %598 = vrot.lane.b32.xlu2 %v1323_v16, %s1201_s11  ;;  %v1489_v1 = vsel %vm299_vm1, %v550_v57, %v552_v62  ;;  %v1493_v2 = vsel %vm299_vm1, %v552_v62, %v550_v57 }
  0xca   : > { %563 = vperm.xlu0 %1132, %v1056_v40  }
  0xcb   : > { %v1457_v46 = vmul.f32 %v536_v43, %v534_v45  ;;  %v1459_v47 = vmul.f32 %v537_v44, %v534_v45 }
  0xcf   : > { %v519_v51 = vpop.permute.xlu1 %518 }
  0xd0   : > { %v520_v52 = vsel %vm306_vm2, %v517_v32, %v519_v51  ;;  %v521_v53 = vsel %vm306_vm2, %v519_v51, %v517_v32 }
  0xd1   : > { %606 = vperm.xlu1 %1133, %v1057_v49   ;;  %615 = vperm.xlu2 %1134, %v1053_v50   ;;  %v545_v55 = vperm.slane %v520_v52, 0  ;;  %v546_v56 = vperm.slane %v521_v53, 0 }
  0xd2   : > { %592 = vrot.lane.b32.xlu0 %v1323_v16, %s1202_s29 }
  0xd7   : > { %v543_v58 = vpop.permute.xlu1 %542 }
  0xd8   : > { %v1474_v60 = vmul.f32 %v545_v55, %v543_v58  ;;  %v1476_v61 = vmul.f32 %v546_v56, %v543_v58 }
  0xd9   : > { %635 = vrot.lane.b32.xlu1 %v1343_v23, %s1202_s29  ;;  %637 = vrot.lane.b32.xlu2 %v1333_v20, %s1202_s29 }
  0xda   : > { %600 = vrot.lane.b32.xlu0 %v1313_v13, %s1201_s11 }
  0xdf   : > { %v556_v5 = vpop.permute.xlu1 %555 }
  0xe0   : > { %v559_v10 = vsel %vm306_vm2, %v556_v5, %v558_v4  ;;  %v560_v11 = vsel %vm306_vm2, %v558_v4, %v556_v5 }
  0xe1   : > { %643 = vrot.lane.b32.xlu1 %v1333_v20, %s1201_s11  ;;  %649 = vperm.xlu2 %1134, %v1058_v63   ;;  %v586_v5 = vperm.slane %v559_v10, 0 }
  0xe2   : > { %626 = vperm.xlu0 %1132, %v1061_v3  }
  0xe9   : > { %669 = vperm.xlu1 %1133, %v1062_v12   ;;  %678 = vrot.lane.b32.xlu2 %v1295_v8, %s1203_s8  ;;  %v587_v12 = vperm.slane %v560_v11, 0 }
  0xea   : > { %641 = vrot.lane.b32.xlu0 %v1343_v23, %s1201_s11 }
  0xed   : > { %v298_v14 = vpop.permute.xlu2 %297 }
  0xf2   : > { %658 = vperm.xlu0 %1132, %v1054_v15  }
  0xf5   : > { %v303_v21 = vpop.permute.xlu2 %302 }
  0xfa   : > { %680 = vrot.lane.b32.xlu0 %v1293_v7, %s1203_s8 }
  0xfd   : > { %v356_v22 = vpop.permute.xlu2 %355 }
 0x104   : > { %v296_v24 = vpop.permute.xlu1 %295  ;;  %v305_v25 = vpop.permute.xlu0 %304 }
 0x105   : > { %v300_v26 = vsel %vm299_vm1, %v296_v24, %v298_v14  ;;  %v301_v8 = vsel %vm299_vm1, %v298_v14, %v296_v24  ;;  %v307_v27 = vsel %vm306_vm2, %v303_v21, %v305_v25  ;;  %v308_v28 = vsel %vm306_vm2, %v305_v25, %v303_v21  ;;  %v414_v30 = vpop.permute.xlu2 %413 }
 0x106   : > { %v323_v32 = vperm.slane %v301_v8, 0  ;;  %v324_v33 = vperm.slane %v300_v26, 0  ;;  %v332_v53 = vperm.slane %v307_v27, 0  ;;  %v333_v55 = vperm.slane %v308_v28, 0 }
 0x108   : > { %v325_v43 = vmul.f32 %v323_v32, %v1378_v29  ;;  %v326_v44 = vmul.f32 %v324_v33, %v1378_v29  ;;  %v334_v29 = vmul.f32 %v332_v53, %v1394_v48  ;;  %v335_v3 = vmul.f32 %v333_v55, %v1394_v48 }
 0x10c   : > { %v352_v34 = vpop.permute.xlu1 %351  ;;  %v350_v7 = vpop.permute.xlu0 %349 }
 0x10d   : > { %v353_v39 = vsel %vm299_vm1, %v350_v7, %v352_v34  ;;  %v354_v40 = vsel %vm299_vm1, %v352_v34, %v350_v7 }
 0x10e   : > { %v377_v41 = vperm.slane %v354_v40, 0  ;;  %v378_v42 = vperm.slane %v353_v39, 0 }
 0x110   : > { %v379_v45 = vmul.f32 %v377_v41, %v1380_v31  ;;  %v380_v49 = vmul.f32 %v378_v42, %v1380_v31 }
 0x112   : > { %v381_v50 = vadd.f32 %v379_v45, %v325_v43  ;;  %v382_v51 = vadd.f32 %v380_v49, %v326_v44 }
 0x113   : > { %v472_v52 = vpop.permute.xlu2 %471 }
 0x114   : > { %v358_v56 = vpop.permute.xlu0 %357 }
 0x115   : > { %v359_v57 = vsel %vm306_vm2, %v356_v22, %v358_v56  ;;  %v360_v58 = vsel %vm306_vm2, %v358_v56, %v356_v22 }
 0x116   : > { %v388_v62 = vperm.slane %v359_v57, 0  ;;  %v389_v63 = vperm.slane %v360_v58, 0  ;;  %v575_v58 = vperm.slane %v1493_v2, 0 }
 0x118   : > { %v390_v31 = vmul.f32 %v388_v62, %v1405_v59  ;;  %v391_v4 = vmul.f32 %v389_v63, %v1405_v59 }
 0x11a   : > { %v392_v14 = vadd.f32 %v390_v31, %v334_v29  ;;  %v393_v15 = vadd.f32 %v391_v4, %v335_v3 }
 0x11b   : > { %v410_v21 = vpop.permute.xlu1 %409  ;;  %v584_v24 = vpop.permute.xlu2 %583 }
 0x11c   : > { %v588_v25 = vmul.f32 %v586_v5, %v584_v24  ;;  %v589_v26 = vmul.f32 %v587_v12, %v584_v24  ;;  %v408_v8 = vpop.permute.xlu0 %407 }
 0x11d   : > { %v411_v22 = vsel %vm299_vm1, %v408_v8, %v410_v21  ;;  %v412_v27 = vsel %vm299_vm1, %v410_v21, %v408_v8 }
 0x11e   : > { %v1545_v48 = vadd.f32 %v588_v25, %v1474_v60  ;;  %v1548_v59 = vadd.f32 %v589_v26, %v1476_v61  ;;  %v435_v10 = vperm.slane %v412_v27, 0  ;;  %v436_v11 = vperm.slane %v411_v22, 0  ;;  %v1579_v27 = vld [vmem:[%s1824_s3] ss:$4 sm:$0x3] }
 0x120   : > { %v437_v28 = vmul.f32 %v435_v10, %v1385_v38  ;;  %v438_v32 = vmul.f32 %v436_v11, %v1385_v38 }
 0x122   : > { %v439_v33 = vadd.f32 %v437_v28, %v381_v50  ;;  %v440_v34 = vadd.f32 %v438_v32, %v382_v51  ;;  %v1592_v28 = vld [vmem:[%s1824_s3 + $0x1] ss:$4 sm:$0x3] }
 0x123   : > { %v1552_v7 = vpop.permute.xlu2 %598 }
 0x124   : > { %v416_v39 = vpop.permute.xlu0 %415 }
 0x125   : > { %v417_v40 = vsel %vm306_vm2, %v414_v30, %v416_v39  ;;  %v418_v60 = vsel %vm306_vm2, %v416_v39, %v414_v30 }
 0x126   : > { %v446_v41 = vperm.slane %v417_v40, 0  ;;  %v447_v61 = vperm.slane %v418_v60, 0 }
 0x128   : > { %v448_v42 = vmul.f32 %v446_v41, %v1416_v0  ;;  %v449_v43 = vmul.f32 %v447_v61, %v1416_v0  ;;  %v576_v0 = vperm.slane %v1489_v1, 0 }
 0x12a   : > { %v450_v44 = vadd.f32 %v448_v42, %v392_v14  ;;  %v451_v45 = vadd.f32 %v449_v43, %v393_v15 }
 0x12b   : > { %v468_v38 = vpop.permute.xlu1 %467  ;;  %v616_v53 = vpop.permute.xlu2 %615 }
 0x12c   : > { %v466_v49 = vpop.permute.xlu0 %465 }
 0x12d   : > { %v469_v50 = vsel %vm299_vm1, %v466_v49, %v468_v38  ;;  %v470_v51 = vsel %vm299_vm1, %v468_v38, %v466_v49 }
 0x12e   : > { %v493_v55 = vperm.slane %v470_v51, 0  ;;  %v494_v56 = vperm.slane %v469_v50, 0 }
 0x130   : > { %v495_v30 = vmul.f32 %v493_v55, %v1403_v54  ;;  %v496_v57 = vmul.f32 %v494_v56, %v1403_v54 }
 0x132   : > { %v497_v62 = vadd.f32 %v495_v30, %v439_v33  ;;  %v498_v63 = vadd.f32 %v496_v57, %v440_v34 }
 0x133   : > { %v573_v29 = vpop.permute.xlu1 %572  ;;  %v638_v21 = vpop.permute.xlu2 %637 }
 0x134   : > { %v577_v3 = vmul.f32 %v575_v58, %v573_v29  ;;  %v578_v31 = vmul.f32 %v576_v0, %v573_v29  ;;  %v474_v4 = vpop.permute.xlu0 %473 }
 0x135   : > { %v475_v5 = vsel %vm306_vm2, %v472_v52, %v474_v4  ;;  %v476_v12 = vsel %vm306_vm2, %v474_v4, %v472_v52  ;;  %v1076_v52 = vld [vmem:[%s1824_s3 + $0x2] ss:$4 sm:$0x3] }
 0x136   : > { %v579_v14 = vadd.f32 %v577_v3, %v1457_v46  ;;  %v580_v54 = vadd.f32 %v578_v31, %v1459_v47  ;;  %v504_v15 = vperm.slane %v475_v5, 0  ;;  %v505_v2 = vperm.slane %v476_v12, 0 }
 0x137   : > { %v886_v11 = vmul.f32 %v1076_v52, %v1579_v27  ;;  %v878_v33 = vperm.slane %v1076_v52, 0  ;;  %v879_v34 = vperm.slane %v1076_v52, 1  ;;  %v896_v39 = vmul.f32 %v1076_v52, %v1592_v28 }
 0x138   : > { %v506_v1 = vmul.f32 %v504_v15, %v1425_v19  ;;  %v507_v24 = vmul.f32 %v505_v2, %v1425_v19 }
 0x139   : > { %v888_v60 = vperm.slane %v886_v11, 0  ;;  %v889_v41 = vperm.slane %v886_v11, 1  ;;  %v882_v55 = vmul.f32 %v878_v33, %v1440_v35  ;;  %v883_v56 = vmul.f32 %v879_v34, %v1442_v37 }
 0x13a   : > { %v508_v25 = vadd.f32 %v506_v1, %v450_v44  ;;  %v509_v26 = vadd.f32 %v507_v24, %v451_v45  ;;  %v898_v30 = vperm.slane %v896_v39, 0  ;;  %v899_v57 = vperm.slane %v896_v39, 1 }
 0x13b   : > { %v595_v8 = vpop.permute.xlu1 %594  ;;  %v650_v32 = vpop.permute.xlu2 %649  ;;  %v892_v31 = vmul.f32 %v888_v60, %v497_v62  ;;  %v893_v4 = vmul.f32 %v889_v41, %v498_v63 }
 0x13c   : > { %v564_v22 = vpop.permute.xlu0 %563  ;;  %v652_v42 = vmul.f32 %v650_v32, %v1343_v23  ;;  %v653_v43 = vmul.f32 %v650_v32, %v1333_v20  ;;  %v902_v1 = vmul.f32 %v898_v30, %v508_v25  ;;  %v903_v24 = vmul.f32 %v899_v57, %v509_v26 }
 0x13d   : > { %v566_v46 = vmul.f32 %v564_v22, %v1303_v9  ;;  %v567_v47 = vmul.f32 %v564_v22, %v1291_v6 }
 0x13f   : > { %v568_v10 = vadd.f32 %v566_v46, %v1421_v17  ;;  %v569_v19 = vadd.f32 %v567_v47, %v1423_v18 }
 0x143   : > { %v607_v40 = vpop.permute.xlu1 %606  ;;  %v679_v30 = vpop.permute.xlu2 %678 }
 0x144   : > { %v609_v61 = vmul.f32 %v607_v40, %v1323_v16  ;;  %v610_v17 = vmul.f32 %v607_v40, %v1313_v13  ;;  %v593_v18 = vpop.permute.xlu0 %592 }
 0x145   : > { %v596_v44 = vsel %vm299_vm1, %v593_v18, %v595_v8  ;;  %v597_v45 = vsel %vm299_vm1, %v595_v8, %v593_v18 }
 0x146   : > { %v611_v38 = vadd.f32 %v609_v61, %v568_v10  ;;  %v612_v49 = vadd.f32 %v610_v17, %v569_v19  ;;  %v618_v50 = vperm.slane %v597_v45, 0  ;;  %v619_v51 = vperm.slane %v596_v44, 0 }
 0x148   : > { %v654_v58 = vadd.f32 %v652_v42, %v611_v38  ;;  %v655_v0 = vadd.f32 %v653_v43, %v612_v49  ;;  %v620_v29 = vmul.f32 %v618_v50, %v616_v53  ;;  %v621_v3 = vmul.f32 %v619_v51, %v616_v53 }
 0x149   : > { %v916_v38 = vperm.slane %v1592_v28, 0  ;;  %v917_v49 = vperm.slane %v1592_v28, 1 }
 0x14a   : > { %v884_v5 = vadd.f32 %v882_v55, %v654_v58  ;;  %v885_v12 = vadd.f32 %v883_v56, %v655_v0  ;;  %v622_v15 = vadd.f32 %v620_v29, %v579_v14  ;;  %v623_v2 = vadd.f32 %v621_v3, %v580_v54 }
 0x14b   : > { %v636_v8 = vpop.permute.xlu1 %635 }
 0x14c   : > { %v894_v22 = vadd.f32 %v892_v31, %v884_v5  ;;  %v895_v46 = vadd.f32 %v893_v4, %v885_v12  ;;  %v639_v35 = vsel %vm299_vm1, %v636_v8, %v638_v21  ;;  %v640_v37 = vsel %vm299_vm1, %v638_v21, %v636_v8  ;;  %v601_v47 = vpop.permute.xlu0 %600 }
 0x14d   : > { %v602_v53 = vsel %vm306_vm2, %v1552_v7, %v601_v47  ;;  %v603_v62 = vsel %vm306_vm2, %v601_v47, %v1552_v7  ;;  %v661_v18 = vperm.slane %v640_v37, 0  ;;  %v662_v42 = vperm.slane %v639_v35, 0 }
 0x14e   : > { %v905_v63 = vadd.f32 %v903_v24, %v895_v46  ;;  %v904_v14 = vadd.f32 %v902_v1, %v894_v22  ;;  %v629_v54 = vperm.slane %v602_v53, 0  ;;  %v630_v25 = vperm.slane %v603_v62, 0  ;;  %v1071_v1 = vld [vmem:[%s1822_s1 + $0x100] sm:$0xff]  ;;  %v1068_v24 = vld [vmem:[%s1822_s1 + $0xe8] sm:$0xff] }
 0x153   : > { %v644_v52 = vpop.permute.xlu1 %643 }
 0x154   : > { %v627_v26 = vpop.permute.xlu0 %626 }
 0x155   : > { %v631_v10 = vmul.f32 %v629_v54, %v627_v26  ;;  %v632_v19 = vmul.f32 %v630_v25, %v627_v26 }
 0x157   : > { %v633_v11 = vadd.f32 %v631_v10, %v1545_v48  ;;  %v634_v21 = vadd.f32 %v632_v19, %v1548_v59  ;;  %v907_v48 = vperm.slane %v1579_v27, 0  ;;  %v908_v59 = vperm.slane %v1579_v27, 1 }
 0x15b   : > { %v670_v40 = vpop.permute.xlu1 %669 }
 0x15c   : > { %v642_v32 = vpop.permute.xlu0 %641 }
 0x15d   : > { %v645_v33 = vsel %vm306_vm2, %v642_v32, %v644_v52  ;;  %v646_v34 = vsel %vm306_vm2, %v644_v52, %v642_v32 }
 0x15e   : > { %v672_v7 = vperm.slane %v645_v33, 0  ;;  %v673_v39 = vperm.slane %v646_v34, 0 }
 0x160   : > { %v674_v60 = vmul.f32 %v672_v7, %v670_v40  ;;  %v675_v41 = vmul.f32 %v673_v39, %v670_v40  ;;  %v1072_v39 = vld [vmem:[%s1822_s1 + $0x108] sm:$0xff] }
 0x161   : > { %v1064_v40 = vld [vmem:[%s1822_s1 + $0xc8] sm:$0xff] }
 0x162   : > { %v676_v61 = vadd.f32 %v674_v60, %v633_v11  ;;  %v677_v17 = vadd.f32 %v675_v41, %v634_v21 }
 0x164   : > { %v659_v43 = vpop.permute.xlu0 %658  ;;  %v920_v57 = vmul.f32 %v916_v38, %v676_v61  ;;  %v921_v58 = vmul.f32 %v917_v49, %v677_v17  ;;  %v1069_v17 = vld [vmem:[%s1822_s1 + $0xf0] sm:$0xff] }
 0x165   : > { %v663_v44 = vmul.f32 %v661_v18, %v659_v43  ;;  %v664_v45 = vmul.f32 %v662_v42, %v659_v43 }
 0x167   : > { %v665_v50 = vadd.f32 %v663_v44, %v622_v15  ;;  %v666_v51 = vadd.f32 %v664_v45, %v623_v2  ;;  %v1067_v15 = vld [vmem:[%s1822_s1 + $0xe0] sm:$0xff]  ;;  %v1073_v45 = vld [vmem:[%s1822_s1 + $0x110] sm:$0xff] }
 0x168   : > { %v1063_v2 = vld [vmem:[%s1822_s1 + $0xc0] sm:$0xff] }
 0x169   : > { %v911_v55 = vmul.f32 %v907_v48, %v665_v50  ;;  %v912_v56 = vmul.f32 %v908_v59, %v666_v51  ;;  %v1070_v48 = vld [vmem:[%s1822_s1 + $0xf8] sm:$0xff] }
 0x16b   : > { %v913_v0 = vadd.f32 %v911_v55, %v904_v14  ;;  %v914_v29 = vadd.f32 %v912_v56, %v905_v63 }
 0x16c   : > { %v681_v3 = vpop.permute.xlu0 %680 }
 0x16d   : > { %v684_v31 = vsel %vm682_vm3, %v681_v3, %v679_v30  ;;  %v683_v4 = vsel %vm682_vm3, %v679_v30, %v681_v3  ;;  %v1630_v5 = vadd.f32 %v921_v58, %v914_v29  ;;  %v1632_v12 = vadd.f32 %v920_v57, %v913_v0 }
 0x16e   : > { %687 = vrot.lane.b32.xlu2 %v684_v31, %s1202_s29  ;;  %691 = vrot.lane.b32.xlu0 %v683_v4, %s1201_s11  ;;  %v702_v22 = vperm.slane %v683_v4, 0  ;;  %v703_v46 = vperm.slane %v684_v31, 0 }
 0x16f   : > { %685 = vrot.lane.b32.xlu1 %v683_v4, %s1202_s29 }
 0x176   : > { %699 = vperm.xlu2 %1134, %v1067_v15   ;;  %708 = vperm.xlu0 %1132, %v1063_v2  }
 0x177   : > { %693 = vrot.lane.b32.xlu1 %v684_v31, %s1201_s11 }
 0x17e   : > { %726 = vrot.lane.b32.xlu0 %v1291_v6, %s1203_s8  ;;  %724 = vrot.lane.b32.xlu2 %v1303_v9, %s1203_s8 }
 0x17f   : > { %717 = vperm.xlu1 %1133, %v1071_v1  }
 0x186   : > { %775 = vrot.lane.b32.xlu0 %v1323_v16, %s1203_s8 }
 0x18e   : > { %828 = vrot.lane.b32.xlu0 %v1333_v20, %s1203_s8 }
 0x196   : > { %744 = vperm.xlu0 %1132, %v1068_v24   ;;  %v1065_v24 = vld [vmem:[%s1822_s1 + $0xd0] sm:$0xff] }
 0x1c8   : > { %v688_v8 = vpop.permute.xlu2 %687 }
 0x1d0   : > { %v700_v35 = vpop.permute.xlu2 %699 }
 0x1d1   : > { %v704_v6 = vmul.f32 %v702_v22, %v700_v35  ;;  %v705_v37 = vmul.f32 %v703_v46, %v700_v35 }
 0x1d8   : > { %v725_v10 = vpop.permute.xlu2 %724 }
 0x1e0   : > { %v692_v47 = vpop.permute.xlu0 %691 }
 0x1e1   : > { %v686_v9 = vpop.permute.xlu1 %685 }
 0x1e2   : > { %v689_v53 = vsel %vm299_vm1, %v686_v9, %v688_v8  ;;  %v690_v16 = vsel %vm299_vm1, %v688_v8, %v686_v9  ;;  %v1066_v9 = vld [vmem:[%s1822_s1 + $0xd8] sm:$0xff] }
 0x1e3   : > { %v711_v20 = vperm.slane %v690_v16, 0  ;;  %v712_v62 = vperm.slane %v689_v53, 0  ;;  %v1077_v16 = vld [vmem:[%s1824_s3 + $0x3] ss:$4 sm:$0x3] }
 0x1e8   : > { %v709_v63 = vpop.permute.xlu0 %708 }
 0x1e9   : > { %v1662_v14 = vmul.f32 %v711_v20, %v709_v63  ;;  %v1664_v54 = vmul.f32 %v712_v62, %v709_v63  ;;  %v694_v25 = vpop.permute.xlu1 %693 }
 0x1ea   : > { %v1668_v26 = vsel %vm306_vm2, %v692_v47, %v694_v25  ;;  %v1672_v52 = vsel %vm306_vm2, %v694_v25, %v692_v47  ;;  %v1074_v47 = vld [vmem:[%s1822_s1 + $0x118] sm:$0xff] }
 0x1f0   : > { %v727_v19 = vpop.permute.xlu0 %726 }
 0x1f1   : > { %v729_v11 = vsel %vm682_vm3, %v727_v19, %v725_v10  ;;  %v728_v21 = vsel %vm682_vm3, %v725_v10, %v727_v19  ;;  %v1701_v59 = vpop.permute.xlu1 %717 }
 0x1f2   : > { %732 = vrot.lane.b32.xlu2 %v729_v11, %s1202_s29  ;;  %730 = vrot.lane.b32.xlu1 %v728_v21, %s1202_s29  ;;  %v747_v34 = vperm.slane %v728_v21, 0  ;;  %v748_v7 = vperm.slane %v729_v11, 0 }
 0x1f8   : > { %v776_v32 = vpop.permute.xlu0 %775 }
 0x1fa   : > { %826 = vrot.lane.b32.xlu2 %v1343_v23, %s1203_s8  ;;  %777 = vrot.lane.b32.xlu1 %v1313_v13, %s1203_s8 }
 0x200   : > { %v829_v33 = vpop.permute.xlu0 %828 }
 0x202   : > { %738 = vrot.lane.b32.xlu2 %v729_v11, %s1201_s11  ;;  %736 = vrot.lane.b32.xlu1 %v728_v21, %s1201_s11 }
 0x208   : > { %v745_v60 = vpop.permute.xlu0 %744 }
 0x209   : > { %v749_v23 = vmul.f32 %v747_v34, %v745_v60  ;;  %v750_v41 = vmul.f32 %v748_v7, %v745_v60 }
 0x20a   : > { %766 = vperm.xlu2 %1134, %v1072_v39   ;;  %755 = vperm.xlu1 %1133, %v1064_v40  }
 0x20b   : > { %v751_v13 = vadd.f32 %v749_v23, %v704_v6  ;;  %v752_v61 = vadd.f32 %v750_v41, %v705_v37 }
 0x212   : > { %795 = vperm.xlu2 %1134, %v1069_v17  }
 0x24c   : > { %v733_v18 = vpop.permute.xlu2 %732 }
 0x254   : > { %v827_v42 = vpop.permute.xlu2 %826 }
 0x255   : > { %v830_v43 = vsel %vm682_vm3, %v827_v42, %v829_v33  ;;  %v831_v8 = vsel %vm682_vm3, %v829_v33, %v827_v42  ;;  %v721_v42 = vperm.slane %v1672_v52, 0 }
 0x256   : > { %832 = vrot.lane.b32.xlu2 %v830_v43, %s1202_s29  ;;  %v850_v20 = vperm.slane %v831_v8, 0  ;;  %v849_v62 = vperm.slane %v830_v43, 0 }
 0x25c   : > { %v1703_v44 = vpop.permute.xlu2 %738 }
 0x25e   : > { %846 = vperm.xlu2 %1134, %v1070_v48  }
 0x264   : > { %v731_v38 = vpop.permute.xlu1 %730  ;;  %v1708_v49 = vpop.permute.xlu2 %766 }
 0x265   : > { %v734_v50 = vsel %vm299_vm1, %v731_v38, %v733_v18  ;;  %v735_v51 = vsel %vm299_vm1, %v733_v18, %v731_v38  ;;  %v720_v18 = vperm.slane %v1668_v26, 0 }
 0x266   : > { %817 = vperm.xlu2 %1134, %v1073_v45   ;;  %v758_v2 = vperm.slane %v735_v51, 0  ;;  %v759_v1 = vperm.slane %v734_v50, 0 }
 0x26c   : > { %v778_v55 = vpop.permute.xlu1 %777  ;;  %v796_v0 = vpop.permute.xlu2 %795 }
 0x26d   : > { %v780_v56 = vsel %vm682_vm3, %v778_v55, %v776_v32  ;;  %v779_v30 = vsel %vm682_vm3, %v776_v32, %v778_v55  ;;  %v722_v55 = vmul.f32 %v720_v18, %v1701_v59 }
 0x26e   : > { %783 = vrot.lane.b32.xlu1 %v780_v56, %s1202_s29  ;;  %v799_v57 = vperm.slane %v780_v56, 0  ;;  %781 = vrot.lane.b32.xlu0 %v779_v30, %s1202_s29  ;;  %v798_v58 = vperm.slane %v779_v30, 0 }
 0x270   : > { %v801_v29 = vmul.f32 %v799_v57, %v796_v0  ;;  %v800_v3 = vmul.f32 %v798_v58, %v796_v0  ;;  %v933_v0 = vmul.f32 %v1077_v16, %v1579_v27 }
 0x272   : > { %v802_v31 = vadd.f32 %v800_v3, %v751_v13  ;;  %v803_v4 = vadd.f32 %v801_v29, %v752_v61  ;;  %v935_v27 = vperm.slane %v933_v0, 0 }
 0x274   : > { %v737_v15 = vpop.permute.xlu1 %736 }
 0x275   : > { %v740_v13 = vsel %vm306_vm2, %v737_v15, %v1703_v44  ;;  %v741_v61 = vsel %vm306_vm2, %v1703_v44, %v737_v15 }
 0x276   : > { %789 = vrot.lane.b32.xlu1 %v780_v56, %s1201_s11  ;;  %787 = vrot.lane.b32.xlu0 %v779_v30, %s1201_s11  ;;  %v769_v17 = vperm.slane %v740_v13, 0  ;;  %v723_v56 = vmul.f32 %v721_v42, %v1701_v59 }
 0x278   : > { %v771_v30 = vmul.f32 %v769_v17, %v1708_v49 }
 0x27c   : > { %v756_v22 = vpop.permute.xlu1 %755 }
 0x27d   : > { %v760_v46 = vmul.f32 %v758_v2, %v756_v22  ;;  %v761_v35 = vmul.f32 %v759_v1, %v756_v22  ;;  %v773_v1 = vadd.f32 %v771_v30, %v722_v55  ;;  %v943_v22 = vmul.f32 %v1077_v16, %v1592_v28 }
 0x27e   : > { %806 = vperm.xlu1 %1133, %v1065_v24   ;;  %834 = vrot.lane.b32.xlu0 %v831_v8, %s1202_s29 }
 0x27f   : > { %v1729_v6 = vadd.f32 %v760_v46, %v1662_v14  ;;  %v1732_v37 = vadd.f32 %v761_v35, %v1664_v54  ;;  %v925_v14 = vperm.slane %v1077_v16, 0  ;;  %v926_v54 = vperm.slane %v1077_v16, 1 }
 0x280   : > { %v945_v28 = vperm.slane %v943_v22, 0  ;;  %v946_v16 = vperm.slane %v943_v22, 1 }
 0x286   : > { %840 = vrot.lane.b32.xlu1 %v831_v8, %s1201_s11  ;;  %838 = vrot.lane.b32.xlu0 %v830_v43, %s1201_s11  ;;  %v770_v43 = vperm.slane %v741_v61, 0  ;;  %v936_v8 = vperm.slane %v933_v0, 1  ;;  %s188_s11 = sand.u32 1, %s1189_s16  }
 0x287   : > { %s1037_s20 = sshll.u32 %s188_s11, 4  ;;  %s958_s19 = scalar_lea.sflag [#allocation3], %s188_s11 }
 0x288   : > { %v772_v26 = vmul.f32 %v770_v43, %v1708_v49  ;;  %s190_s28 = scalar_lea.vmem [#allocation2], %s1037_s20 }
 0x289   : > { %s971_s12 = sshll.u32 %s190_s28, 4  ;;  %s972_s12 = int_to_ptr.vmem [resolvable:$true] %s971_s12 }
 0x28a   : > { %v774_v24 = vadd.f32 %v772_v26, %v723_v56 }
 0x28e   : > { %868 = vperm.xlu1 %1133, %v1074_v47   ;;  %857 = vperm.xlu0 %1132, %v1066_v9  }
 0x2b0   : > { %v833_v53 = vpop.permute.xlu2 %832 }
 0x2b8   : > { %v847_v63 = vpop.permute.xlu2 %846 }
 0x2b9   : > { %v851_v25 = vmul.f32 %v849_v62, %v847_v63  ;;  %v852_v10 = vmul.f32 %v850_v20, %v847_v63 }
 0x2bb   : > { %v853_v19 = vadd.f32 %v851_v25, %v802_v31  ;;  %v854_v11 = vadd.f32 %v852_v10, %v803_v4 }
 0x2bd   : > { %v929_v21 = vmul.f32 %v925_v14, %v853_v19  ;;  %v930_v32 = vmul.f32 %v926_v54, %v854_v11 }
 0x2bf   : > { %v1746_v33 = vadd.f32 %v929_v21, %v1632_v12  ;;  %v1749_v34 = vadd.f32 %v930_v32, %v1630_v5 }
 0x2c0   : > { %v818_v52 = vpop.permute.xlu2 %817 }
 0x2e0   : > { %v782_v7 = vpop.permute.xlu0 %781  ;;  %v784_v39 = vpop.permute.xlu1 %783 }
 0x2e1   : > { %v785_v48 = vsel %vm299_vm1, %v782_v7, %v784_v39  ;;  %v786_v45 = vsel %vm299_vm1, %v784_v39, %v782_v7 }
 0x2e2   : > { %v809_v57 = vperm.slane %v786_v45, 0  ;;  %v810_v58 = vperm.slane %v785_v48, 0 }
 0x2e8   : > { %v788_v40 = vpop.permute.xlu0 %787  ;;  %v790_v60 = vpop.permute.xlu1 %789 }
 0x2e9   : > { %v791_v12 = vsel %vm306_vm2, %v788_v40, %v790_v60  ;;  %v792_v5 = vsel %vm306_vm2, %v790_v60, %v788_v40 }
 0x2ea   : > { %v820_v38 = vperm.slane %v791_v12, 0  ;;  %v821_v44 = vperm.slane %v792_v5, 0 }
 0x2ec   : > { %v822_v29 = vmul.f32 %v820_v38, %v818_v52  ;;  %v823_v3 = vmul.f32 %v821_v44, %v818_v52 }
 0x2ee   : > { %v824_v36 = vadd.f32 %v822_v29, %v773_v1  ;;  %v825_v63 = vadd.f32 %v823_v3, %v774_v24 }
 0x2f0   : > { %v835_v23 = vpop.permute.xlu0 %834  ;;  %v807_v41 = vpop.permute.xlu1 %806 }
 0x2f1   : > { %v836_v31 = vsel %vm299_vm1, %v833_v53, %v835_v23  ;;  %v837_v4 = vsel %vm299_vm1, %v835_v23, %v833_v53  ;;  %v811_v15 = vmul.f32 %v809_v57, %v807_v41  ;;  %v812_v2 = vmul.f32 %v810_v58, %v807_v41 }
 0x2f2   : > { %v860_v46 = vperm.slane %v837_v4, 0  ;;  %v861_v35 = vperm.slane %v836_v31, 0 }
 0x2f3   : > { %v813_v53 = vadd.f32 %v811_v15, %v1729_v6  ;;  %v814_v20 = vadd.f32 %v812_v2, %v1732_v37 }
 0x2f8   : > { %v839_v50 = vpop.permute.xlu0 %838  ;;  %v841_v51 = vpop.permute.xlu1 %840 }
 0x2f9   : > { %v842_v59 = vsel %vm306_vm2, %v839_v50, %v841_v51  ;;  %v843_v49 = vsel %vm306_vm2, %v841_v51, %v839_v50 }
 0x2fa   : > { %v871_v47 = vperm.slane %v842_v59, 0  ;;  %v872_v9 = vperm.slane %v843_v49, 0 }
 0x300   : > { %v858_v62 = vpop.permute.xlu0 %857  ;;  %v869_v14 = vpop.permute.xlu1 %868 }
 0x301   : > { %v862_v54 = vmul.f32 %v860_v46, %v858_v62  ;;  %v863_v25 = vmul.f32 %v861_v35, %v858_v62  ;;  %v873_v10 = vmul.f32 %v871_v47, %v869_v14  ;;  %v874_v19 = vmul.f32 %v872_v9, %v869_v14 }
 0x303   : > { %v864_v11 = vadd.f32 %v862_v54, %v813_v53  ;;  %v865_v21 = vadd.f32 %v863_v25, %v814_v20  ;;  %v875_v32 = vadd.f32 %v873_v10, %v824_v36  ;;  %v876_v7 = vadd.f32 %v874_v19, %v825_v63 }
 0x305   : > { %v939_v6 = vmul.f32 %v935_v27, %v864_v11  ;;  %v940_v37 = vmul.f32 %v936_v8, %v865_v21  ;;  %v949_v60 = vmul.f32 %v945_v28, %v875_v32  ;;  %v950_v23 = vmul.f32 %v946_v16, %v876_v7 }
 0x307   : > { %v941_v39 = vadd.f32 %v939_v6, %v1746_v33  ;;  %v942_v40 = vadd.f32 %v940_v37, %v1749_v34 }
 0x309   : > { %v951_v41 = vadd.f32 %v949_v60, %v941_v39  ;;  %v952_v13 = vadd.f32 %v950_v23, %v942_v40 }
 0x30b   : > { %v953_v61 = vmax.f32 %v951_v41, 0.0  ;;  %v954_v12 = vmax.f32 %v952_v13, 0.0 }
 0x30d   : > { %955 = vst [vmem:[%s190_s28] sm:$0xff] %v953_v61 }
 0x30e   : > { %956 = vst [vmem:[%s190_s28 + $0x8] sm:$0xff] %v954_v12 }
 0x30f   : > { %1162 = shalt.err (!%p1159_p3)
}
 0x310   : > { %1088 = dma.vmem_to_hbm [thread:$0]  (%p1267_p5), %s972_s12, 256, %s974_s30, %s958_s19  }
 0x311 PF: > { %p1094_p4 = scmp.ge.s32.totalorder %s1197_s18, 2  ;;  %s985_s14 = sand.u32 1, %s1185_s15  }
 0x312   : > { %s986_s11 = scalar_lea.sflag [#allocation3], %s985_s14 }
 0x313   : > { %p1091_p7 = pnand %p1094_p4, %p1271_p6 }
 0x315   : > { %p1092_p8 = pneg %p1091_p7 }
 0x317   : > { %1180 = dma.done.wait (%p1092_p8), %s986_s11, 256  }
 0x318   : > { %1182 = vsyncadd (%p1092_p8), %s986_s11, 4294967040  ;;  %p14_p9 = scmp.ge.s32.totalorder %s1254_s21, 4   ;;  %s1828_s15 = smov %s1189_s16 }
 0x319   : > { %s1829_s16 = smov %s1193_s17  ;;  %s1830_s17 = smov %s1265_s24 }
 0x31a   : > { %s1831_s18 = smov %s1254_s21  ;;  %16 = sbr.rel (!%p14_p9) target bundleno = 3 (0x3), region = 112 }
 0x31f   :  { %992 = vsyncpa [#allocation3], 1 }
 0x320   :  { %994 = vsyncpa [#allocation3 + $0x1], 1 }

</bundles_post_ra>
